<compile_context>
chip_gen: v7x
topology: tpu7x:2x2x1
jax: 0.10.0
libtpu: 0.0.40
codegen_flags: <defaults>
</compile_context>

<pallas_src>
import functools

import jax
import jax.numpy as jnp
from jax.experimental import pallas as pl
from jax.experimental.pallas import tpu as pltpu


def generator_kernel(
    z_ref,
    w1_ref, b1_ref,
    w2_ref, g2_ref, be2_ref,
    w3_ref, g3_ref, be3_ref,
    w4_ref, g4_ref, be4_ref,
    w5_ref, b5_ref,
    out_ref,
):
    eps = jnp.float32(0.8)
    bf16 = jnp.bfloat16
    inv_n = jnp.float32(1.0 / z_ref.shape[0])

    def bn_lrelu(x, gamma, beta):
        # BatchNorm1d (training mode, biased variance, eps=0.8) in one pass:
        # per-feature sum / sum-of-squares -> scale/shift row, then a single
        # fused mul+add + LeakyReLU(0.2) + bf16 cast over (batch, dout).
        s = jnp.sum(x, axis=0, keepdims=True)
        ss = jnp.sum(x * x, axis=0, keepdims=True)
        mean = s * inv_n
        var = ss * inv_n - mean * mean
        scale = jax.lax.rsqrt(var + eps) * gamma       # (1, dout)
        shift = beta - mean * scale                    # (1, dout)
        y = x * scale + shift
        return jnp.maximum(y, 0.2 * y).astype(bf16)

    z = z_ref[...].astype(bf16)

    # block(latent_dim, 128, normalize=False)
    h = jnp.dot(z, w1_ref[...], preferred_element_type=jnp.float32) + b1_ref[...]
    h = jnp.maximum(h, 0.2 * h).astype(bf16)

    # block(128, 256)   — Linear bias omitted: cancels under batch-stat BN.
    h = bn_lrelu(jnp.dot(h, w2_ref[...], preferred_element_type=jnp.float32),
                 g2_ref[...], be2_ref[...])

    # block(256, 512)
    h = bn_lrelu(jnp.dot(h, w3_ref[...], preferred_element_type=jnp.float32),
                 g3_ref[...], be3_ref[...])

    # block(512, 1024)
    h = bn_lrelu(jnp.dot(h, w4_ref[...], preferred_element_type=jnp.float32),
                 g4_ref[...], be4_ref[...])

    # Linear(1024, fn_pad) + Tanh (fn zero-padded to 128 lanes; caller slices).
    h = jnp.dot(h, w5_ref[...], preferred_element_type=jnp.float32) + b5_ref[...]
    out_ref[...] = jnp.tanh(h)


def _round_up(x, m):
    return ((x + m - 1) // m) * m


def init_params(key, latent_dim, fn):
    """PyTorch-style uniform ±1/sqrt(fan_in) init.

    Weights are pre-transposed to (in, out) and stored in bf16; biases and BN
    params stay f32.  The final layer is zero-padded to a 128-lane width so
    the kernel's output stores are lane-dense.  b2/b3/b4 are generated for
    PyTorch parity (and used by the reference) but the kernel does not need
    them: they cancel exactly under training-mode BatchNorm.
    """
    fn_pad = _round_up(fn, 128)
    dims = [(latent_dim, 128), (128, 256), (256, 512), (512, 1024), (1024, fn)]
    params = []
    for idx, (din, dout) in enumerate(dims):
        key, kw, kb = jax.random.split(key, 3)
        bound = 1.0 / (din ** 0.5)
        w = jax.random.uniform(kw, (din, dout), jnp.float32, -bound, bound)
        b = jax.random.uniform(kb, (1, dout), jnp.float32, -bound, bound)
        if idx == len(dims) - 1 and fn_pad != fn:
            w = jnp.pad(w, ((0, 0), (0, fn_pad - fn)))
            b = jnp.pad(b, ((0, 0), (0, fn_pad - fn)))
        params.append((w.astype(jnp.bfloat16), b))
    # BatchNorm affine params for layers 2,3,4 (gamma=1, beta=0 at init).
    bn = []
    for dout in (256, 512, 1024):
        bn.append((jnp.ones((1, dout), jnp.float32),
                   jnp.zeros((1, dout), jnp.float32)))
    return params, bn


def _vmem_limit_bytes(batch, latent_dim, fn_pad):
    # bf16 weights + f32 activations (plus bf16 activation copies feeding the
    # MXU); clamp to [16, 40] MiB: plenty on v5e/v6e (128 MiB VMEM) and leaves
    # headroom on v7x (64 MiB physical per TensorCore).
    weight_bytes = 2 * (latent_dim * 128 + 128 * 256 + 256 * 512
                        + 512 * 1024 + 1024 * fn_pad)
    act_bytes = 4 * batch * (latent_dim + 128 + 256 + 512 + 1024 + fn_pad)
    need = 2 * weight_bytes + 3 * act_bytes + (4 << 20)
    return int(min(max(need, 16 << 20), 40 << 20))


@functools.partial(jax.jit, static_argnames=("fn",))
def generator_forward(z, params, bn, fn):
    (w1, b1), (w2, _b2), (w3, _b3), (w4, _b4), (w5, b5) = params
    (g2, be2), (g3, be3), (g4, be4) = bn
    batch, latent_dim = z.shape
    fn_pad = w5.shape[1]

    args = (z,
            w1, b1,
            w2, g2, be2,
            w3, g3, be3,
            w4, g4, be4,
            w5, b5)

    vmem = pl.BlockSpec(memory_space=pltpu.MemorySpace.VMEM)

    # TODO(synk): for batches whose f32 activations exceed VMEM (~2048 on
    # v7x's 64 MiB/TC, ~4096 on v5e/v6e), add a batch grid axis
    # (dimension_semantics=("parallel",), batch tile a multiple of 256 on
    # v6e/v7x / 128 on v5e, weights pinned resident via constant index_maps)
    # with a two-pass BatchNorm so statistics still cover the full batch.
    out = pl.pallas_call(
        generator_kernel,
        out_shape=jax.ShapeDtypeStruct((batch, fn_pad), jnp.float32),
        in_specs=[vmem] * len(args),
        out_specs=vmem,
        compiler_params=pltpu.CompilerParams(
            vmem_limit_bytes=_vmem_limit_bytes(batch, latent_dim, fn_pad)),
    )(*args)
    return out[:, :fn]


def generator_reference(z, params, bn, fn):
    """Pure-JAX f32 reference (bf16 weights upcast, f32 activations, full
    PyTorch forward incl. the b2/b3/b4 biases that cancel under BN)."""
    (w1, b1), (w2, b2), (w3, b3), (w4, b4), (w5, b5) = params
    (g2, be2), (g3, be3), (g4, be4) = bn
    eps = 0.8
    f32 = jnp.float32
    hp = jax.lax.Precision.HIGHEST

    def bnorm(x, g, b):
        mu = jnp.mean(x, axis=0, keepdims=True)
        var = jnp.mean((x - mu) ** 2, axis=0, keepdims=True)
        return (x - mu) / jnp.sqrt(var + eps) * g + b

    def lrelu(x):
        return jnp.maximum(x, 0.2 * x)

    h = lrelu(jnp.dot(z, w1.astype(f32), precision=hp) + b1)
    h = lrelu(bnorm(jnp.dot(h, w2.astype(f32), precision=hp) + b2, g2, be2))
    h = lrelu(bnorm(jnp.dot(h, w3.astype(f32), precision=hp) + b3, g3, be3))
    h = lrelu(bnorm(jnp.dot(h, w4.astype(f32), precision=hp) + b4, g4, be4))
    return jnp.tanh(jnp.dot(h, w5.astype(f32), precision=hp) + b5)[:, :fn]


if __name__ == "__main__":
    latent_dim = 32
    fn = 34          # e.g. 17 keypoints * 2 coords
    batch = 8

    key = jax.random.PRNGKey(0)
    kz, kp = jax.random.split(key)
    z = jax.random.normal(kz, (batch, latent_dim), jnp.float32)
    params, bn = init_params(kp, latent_dim, fn)

    out = generator_forward(z, params, bn, fn)
    out = jax.block_until_ready(out)
    assert out.shape == (batch, fn)

    ref = generator_reference(z, params, bn, fn)
    max_err = float(jnp.max(jnp.abs(out - ref)))
    # Note: weights live in bf16 (same in kernel and reference) and the kernel
    # feeds bf16 activations to the MXU while the reference keeps f32
    # activations, hence the relaxed tolerance vs the pure-f32 PyTorch model.
    assert jnp.allclose(out, ref, atol=4e-2, rtol=4e-2), f"mismatch: {max_err}"

    print("KERNEL_OK")
</pallas_src>

<mosaic_0001>
module attributes {stable_mosaic.version = 11 : i64} {
  func.func @generator_kernel(%arg0: memref<8x32xf32, #tpu.memory_space<vmem>>, %arg1: memref<32x128xbf16, #tpu.memory_space<vmem>>, %arg2: memref<1x128xf32, #tpu.memory_space<vmem>>, %arg3: memref<128x256xbf16, #tpu.memory_space<vmem>>, %arg4: memref<1x256xf32, #tpu.memory_space<vmem>>, %arg5: memref<1x256xf32, #tpu.memory_space<vmem>>, %arg6: memref<256x512xbf16, #tpu.memory_space<vmem>>, %arg7: memref<1x512xf32, #tpu.memory_space<vmem>>, %arg8: memref<1x512xf32, #tpu.memory_space<vmem>>, %arg9: memref<512x1024xbf16, #tpu.memory_space<vmem>>, %arg10: memref<1x1024xf32, #tpu.memory_space<vmem>>, %arg11: memref<1x1024xf32, #tpu.memory_space<vmem>>, %arg12: memref<1024x128xbf16, #tpu.memory_space<vmem>>, %arg13: memref<1x128xf32, #tpu.memory_space<vmem>>, %arg14: memref<8x128xf32, #tpu.memory_space<vmem>>) attributes {dimension_semantics = [], scalar_prefetch = 0 : i64, scratch_operands = 0 : i64, tpu.core_type = #tpu.core_type<tc>} {
    %c0 = arith.constant 0 : index
    %c0_0 = arith.constant 0 : index
    %0 = vector.load %arg0[%c0, %c0_0] : memref<8x32xf32, #tpu.memory_space<vmem>>, vector<8x32xf32>
    %1 = arith.truncf %0 : vector<8x32xf32> to vector<8x32xbf16>
    %c0_1 = arith.constant 0 : index
    %c0_2 = arith.constant 0 : index
    %2 = vector.load %arg1[%c0_1, %c0_2] : memref<32x128xbf16, #tpu.memory_space<vmem>>, vector<32x128xbf16>
    %cst = arith.constant dense<0.000000e+00> : vector<8x128xf32>
    %3 = tpu.matmul %1, %2, %cst {dimension_numbers = #tpu.dot_dimension_numbers<[1], [0], [0], [1], [0, 0, 1, 1], [], []>} : vector<8x32xbf16>, vector<32x128xbf16>, vector<8x128xf32> -> vector<8x128xf32>
    %c0_3 = arith.constant 0 : index
    %c0_4 = arith.constant 0 : index
    %4 = vector.load %arg2[%c0_3, %c0_4] : memref<1x128xf32, #tpu.memory_space<vmem>>, vector<1x128xf32>
    %5 = vector.broadcast %4 : vector<1x128xf32> to vector<8x128xf32>
    %6 = arith.addf %3, %5 : vector<8x128xf32>
    %cst_5 = arith.constant 2.000000e-01 : f32
    %7 = vector.broadcast %cst_5 : f32 to vector<8x128xf32>
    %8 = arith.mulf %7, %6 : vector<8x128xf32>
    %9 = arith.maximumf %6, %8 : vector<8x128xf32>
    %10 = arith.truncf %9 : vector<8x128xf32> to vector<8x128xbf16>
    %c0_6 = arith.constant 0 : index
    %c0_7 = arith.constant 0 : index
    %11 = vector.load %arg3[%c0_6, %c0_7] : memref<128x256xbf16, #tpu.memory_space<vmem>>, vector<128x256xbf16>
    %cst_8 = arith.constant dense<0.000000e+00> : vector<8x256xf32>
    %12 = tpu.matmul %10, %11, %cst_8 {dimension_numbers = #tpu.dot_dimension_numbers<[1], [0], [0], [1], [0, 0, 1, 1], [], []>} : vector<8x128xbf16>, vector<128x256xbf16>, vector<8x256xf32> -> vector<8x256xf32>
    %c0_9 = arith.constant 0 : index
    %c0_10 = arith.constant 0 : index
    %13 = vector.load %arg4[%c0_9, %c0_10] : memref<1x256xf32, #tpu.memory_space<vmem>>, vector<1x256xf32>
    %c0_11 = arith.constant 0 : index
    %c0_12 = arith.constant 0 : index
    %14 = vector.load %arg5[%c0_11, %c0_12] : memref<1x256xf32, #tpu.memory_space<vmem>>, vector<1x256xf32>
    %cst_13 = arith.constant dense<0.000000e+00> : vector<256xf32>
    %15 = vector.multi_reduction <add>, %12, %cst_13 [0] : vector<8x256xf32> to vector<256xf32>
    %16 = vector.shape_cast %15 : vector<256xf32> to vector<1x256xf32>
    %17 = arith.mulf %12, %12 : vector<8x256xf32>
    %cst_14 = arith.constant dense<0.000000e+00> : vector<256xf32>
    %18 = vector.multi_reduction <add>, %17, %cst_14 [0] : vector<8x256xf32> to vector<256xf32>
    %19 = vector.shape_cast %18 : vector<256xf32> to vector<1x256xf32>
    %cst_15 = arith.constant 1.250000e-01 : f32
    %20 = vector.broadcast %cst_15 : f32 to vector<1x256xf32>
    %21 = arith.mulf %16, %20 : vector<1x256xf32>
    %cst_16 = arith.constant 1.250000e-01 : f32
    %22 = vector.broadcast %cst_16 : f32 to vector<1x256xf32>
    %23 = arith.mulf %19, %22 : vector<1x256xf32>
    %24 = arith.mulf %21, %21 : vector<1x256xf32>
    %25 = arith.subf %23, %24 : vector<1x256xf32>
    %cst_17 = arith.constant 8.000000e-01 : f32
    %26 = vector.broadcast %cst_17 : f32 to vector<1x256xf32>
    %27 = arith.addf %25, %26 : vector<1x256xf32>
    %28 = math.rsqrt %27 : vector<1x256xf32>
    %29 = arith.mulf %28, %13 : vector<1x256xf32>
    %30 = arith.mulf %21, %29 : vector<1x256xf32>
    %31 = arith.subf %14, %30 : vector<1x256xf32>
    %32 = vector.broadcast %29 : vector<1x256xf32> to vector<8x256xf32>
    %33 = arith.mulf %12, %32 : vector<8x256xf32>
    %34 = vector.broadcast %31 : vector<1x256xf32> to vector<8x256xf32>
    %35 = arith.addf %33, %34 : vector<8x256xf32>
    %cst_18 = arith.constant 2.000000e-01 : f32
    %36 = vector.broadcast %cst_18 : f32 to vector<8x256xf32>
    %37 = arith.mulf %36, %35 : vector<8x256xf32>
    %38 = arith.maximumf %35, %37 : vector<8x256xf32>
    %39 = arith.truncf %38 : vector<8x256xf32> to vector<8x256xbf16>
    %c0_19 = arith.constant 0 : index
    %c0_20 = arith.constant 0 : index
    %40 = vector.load %arg6[%c0_19, %c0_20] : memref<256x512xbf16, #tpu.memory_space<vmem>>, vector<256x512xbf16>
    %cst_21 = arith.constant dense<0.000000e+00> : vector<8x512xf32>
    %41 = tpu.matmul %39, %40, %cst_21 {dimension_numbers = #tpu.dot_dimension_numbers<[1], [0], [0], [1], [0, 0, 1, 1], [], []>} : vector<8x256xbf16>, vector<256x512xbf16>, vector<8x512xf32> -> vector<8x512xf32>
    %c0_22 = arith.constant 0 : index
    %c0_23 = arith.constant 0 : index
    %42 = vector.load %arg7[%c0_22, %c0_23] : memref<1x512xf32, #tpu.memory_space<vmem>>, vector<1x512xf32>
    %c0_24 = arith.constant 0 : index
    %c0_25 = arith.constant 0 : index
    %43 = vector.load %arg8[%c0_24, %c0_25] : memref<1x512xf32, #tpu.memory_space<vmem>>, vector<1x512xf32>
    %cst_26 = arith.constant dense<0.000000e+00> : vector<512xf32>
    %44 = vector.multi_reduction <add>, %41, %cst_26 [0] : vector<8x512xf32> to vector<512xf32>
    %45 = vector.shape_cast %44 : vector<512xf32> to vector<1x512xf32>
    %46 = arith.mulf %41, %41 : vector<8x512xf32>
    %cst_27 = arith.constant dense<0.000000e+00> : vector<512xf32>
    %47 = vector.multi_reduction <add>, %46, %cst_27 [0] : vector<8x512xf32> to vector<512xf32>
    %48 = vector.shape_cast %47 : vector<512xf32> to vector<1x512xf32>
    %cst_28 = arith.constant 1.250000e-01 : f32
    %49 = vector.broadcast %cst_28 : f32 to vector<1x512xf32>
    %50 = arith.mulf %45, %49 : vector<1x512xf32>
    %cst_29 = arith.constant 1.250000e-01 : f32
    %51 = vector.broadcast %cst_29 : f32 to vector<1x512xf32>
    %52 = arith.mulf %48, %51 : vector<1x512xf32>
    %53 = arith.mulf %50, %50 : vector<1x512xf32>
    %54 = arith.subf %52, %53 : vector<1x512xf32>
    %cst_30 = arith.constant 8.000000e-01 : f32
    %55 = vector.broadcast %cst_30 : f32 to vector<1x512xf32>
    %56 = arith.addf %54, %55 : vector<1x512xf32>
    %57 = math.rsqrt %56 : vector<1x512xf32>
    %58 = arith.mulf %57, %42 : vector<1x512xf32>
    %59 = arith.mulf %50, %58 : vector<1x512xf32>
    %60 = arith.subf %43, %59 : vector<1x512xf32>
    %61 = vector.broadcast %58 : vector<1x512xf32> to vector<8x512xf32>
    %62 = arith.mulf %41, %61 : vector<8x512xf32>
    %63 = vector.broadcast %60 : vector<1x512xf32> to vector<8x512xf32>
    %64 = arith.addf %62, %63 : vector<8x512xf32>
    %cst_31 = arith.constant 2.000000e-01 : f32
    %65 = vector.broadcast %cst_31 : f32 to vector<8x512xf32>
    %66 = arith.mulf %65, %64 : vector<8x512xf32>
    %67 = arith.maximumf %64, %66 : vector<8x512xf32>
    %68 = arith.truncf %67 : vector<8x512xf32> to vector<8x512xbf16>
    %c0_32 = arith.constant 0 : index
    %c0_33 = arith.constant 0 : index
    %69 = vector.load %arg9[%c0_32, %c0_33] : memref<512x1024xbf16, #tpu.memory_space<vmem>>, vector<512x1024xbf16>
    %cst_34 = arith.constant dense<0.000000e+00> : vector<8x1024xf32>
    %70 = tpu.matmul %68, %69, %cst_34 {dimension_numbers = #tpu.dot_dimension_numbers<[1], [0], [0], [1], [0, 0, 1, 1], [], []>} : vector<8x512xbf16>, vector<512x1024xbf16>, vector<8x1024xf32> -> vector<8x1024xf32>
    %c0_35 = arith.constant 0 : index
    %c0_36 = arith.constant 0 : index
    %71 = vector.load %arg10[%c0_35, %c0_36] : memref<1x1024xf32, #tpu.memory_space<vmem>>, vector<1x1024xf32>
    %c0_37 = arith.constant 0 : index
    %c0_38 = arith.constant 0 : index
    %72 = vector.load %arg11[%c0_37, %c0_38] : memref<1x1024xf32, #tpu.memory_space<vmem>>, vector<1x1024xf32>
    %cst_39 = arith.constant dense<0.000000e+00> : vector<1024xf32>
    %73 = vector.multi_reduction <add>, %70, %cst_39 [0] : vector<8x1024xf32> to vector<1024xf32>
    %74 = vector.shape_cast %73 : vector<1024xf32> to vector<1x1024xf32>
    %75 = arith.mulf %70, %70 : vector<8x1024xf32>
    %cst_40 = arith.constant dense<0.000000e+00> : vector<1024xf32>
    %76 = vector.multi_reduction <add>, %75, %cst_40 [0] : vector<8x1024xf32> to vector<1024xf32>
    %77 = vector.shape_cast %76 : vector<1024xf32> to vector<1x1024xf32>
    %cst_41 = arith.constant 1.250000e-01 : f32
    %78 = vector.broadcast %cst_41 : f32 to vector<1x1024xf32>
    %79 = arith.mulf %74, %78 : vector<1x1024xf32>
    %cst_42 = arith.constant 1.250000e-01 : f32
    %80 = vector.broadcast %cst_42 : f32 to vector<1x1024xf32>
    %81 = arith.mulf %77, %80 : vector<1x1024xf32>
    %82 = arith.mulf %79, %79 : vector<1x1024xf32>
    %83 = arith.subf %81, %82 : vector<1x1024xf32>
    %cst_43 = arith.constant 8.000000e-01 : f32
    %84 = vector.broadcast %cst_43 : f32 to vector<1x1024xf32>
    %85 = arith.addf %83, %84 : vector<1x1024xf32>
    %86 = math.rsqrt %85 : vector<1x1024xf32>
    %87 = arith.mulf %86, %71 : vector<1x1024xf32>
    %88 = arith.mulf %79, %87 : vector<1x1024xf32>
    %89 = arith.subf %72, %88 : vector<1x1024xf32>
    %90 = vector.broadcast %87 : vector<1x1024xf32> to vector<8x1024xf32>
    %91 = arith.mulf %70, %90 : vector<8x1024xf32>
    %92 = vector.broadcast %89 : vector<1x1024xf32> to vector<8x1024xf32>
    %93 = arith.addf %91, %92 : vector<8x1024xf32>
    %cst_44 = arith.constant 2.000000e-01 : f32
    %94 = vector.broadcast %cst_44 : f32 to vector<8x1024xf32>
    %95 = arith.mulf %94, %93 : vector<8x1024xf32>
    %96 = arith.maximumf %93, %95 : vector<8x1024xf32>
    %97 = arith.truncf %96 : vector<8x1024xf32> to vector<8x1024xbf16>
    %c0_45 = arith.constant 0 : index
    %c0_46 = arith.constant 0 : index
    %98 = vector.load %arg12[%c0_45, %c0_46] : memref<1024x128xbf16, #tpu.memory_space<vmem>>, vector<1024x128xbf16>
    %cst_47 = arith.constant dense<0.000000e+00> : vector<8x128xf32>
    %99 = tpu.matmul %97, %98, %cst_47 {dimension_numbers = #tpu.dot_dimension_numbers<[1], [0], [0], [1], [0, 0, 1, 1], [], []>} : vector<8x1024xbf16>, vector<1024x128xbf16>, vector<8x128xf32> -> vector<8x128xf32>
    %c0_48 = arith.constant 0 : index
    %c0_49 = arith.constant 0 : index
    %100 = vector.load %arg13[%c0_48, %c0_49] : memref<1x128xf32, #tpu.memory_space<vmem>>, vector<1x128xf32>
    %101 = vector.broadcast %100 : vector<1x128xf32> to vector<8x128xf32>
    %102 = arith.addf %99, %101 : vector<8x128xf32>
    %103 = math.tanh %102 : vector<8x128xf32>
    %c0_50 = arith.constant 0 : index
    %c0_51 = arith.constant 0 : index
    %104 = vector.load %arg14[%c0_50, %c0_51] : memref<8x128xf32, #tpu.memory_space<vmem>>, vector<8x128xf32>
    tpu.vector_store %arg14[%c0_50, %c0_51], %103 {strides = array<i32>} : memref<8x128xf32, #tpu.memory_space<vmem>>, vector<8x128xf32>,
    return
  }
}

</mosaic_0001>

<bundles_post_ra>
// kernel: generator_forward.1
= control target key start
LH: loop header
LB: loop body
LE: loop exit
PB: predicated region body
PF: predicated region fallthrough
CT: control target
= control target key end

     0   :  { %19 = vsyncpa [#allocation3], 0  ;;  %s5545_s0 = inlined_call_operand.hbm [shape: f32[8,32], index: 0, kind: input, shape index: {}]   ;;  %s5546_s1 = inlined_call_operand.hbm [shape: bf16[32,128], index: 1, kind: input, shape index: {}]   ;;  %s5547_s2 = inlined_call_operand.hbm [shape: f32[1,128], index: 2, kind: input, shape index: {}]   ;;  %s5548_s3 = inlined_call_operand.hbm [shape: bf16[128,256], index: 3, kind: input, shape index: {}]   ;;  %s5549_s4 = inlined_call_operand.vmem [shape: f32[1,256], index: 4, kind: input, shape index: {}]   ;;  %s5550_s5 = inlined_call_operand.vmem [shape: f32[1,256], index: 5, kind: input, shape index: {}]   ;;  %s5551_s6 = inlined_call_operand.hbm [shape: bf16[256,512], index: 6, kind: input, shape index: {}]   ;;  %s5552_s7 = inlined_call_operand.vmem [shape: f32[1,512], index: 7, kind: input, shape index: {}]   ;;  %s5553_s8 = inlined_call_operand.vmem [shape: f32[1,512], index: 8, kind: input, shape index: {}]   ;;  %s5554_s9 = inlined_call_operand.hbm [shape: bf16[512,1024], index: 9, kind: input, shape index: {}]   ;;  %s5555_s10 = inlined_call_operand.vmem [shape: f32[1,1024], index: 10, kind: input, shape index: {}]   ;;  %s5556_s11 = inlined_call_operand.vmem [shape: f32[1,1024], index: 11, kind: input, shape index: {}]   ;;  %s5557_s12 = inlined_call_operand.hbm [shape: bf16[1024,128], index: 12, kind: input, shape index: {}]   ;;  %s5558_s13 = inlined_call_operand.hbm [shape: f32[1,128], index: 13, kind: input, shape index: {}]   ;;  %s5559_s14 = inlined_call_operand.hbm [shape: f32[8,128], index: 14, kind: output, shape index: {}]  }
   0x1   :  { %20 = vsyncpa [#allocation6], 0 }
   0x2   :  { %21 = vsyncpa [#allocation9], 0 }
   0x3   :  { %22 = vsyncpa [#allocation12], 0 }
   0x4   :  { %23 = vsyncpa [#allocation15], 0 }
   0x5   :  { %24 = vsyncpa [#allocation4], 0  ;;  %s5038_s29 = smov [#allocation5]   ;;  %s4828_s17 = scalar_lea.hbm %s5546_s1, 256 }
   0x6   :  { %s40_s30 = sshll.u32 %s5038_s29, 4  ;;  %p4829_p0 = scmp.ne.s32.totalorder %s5546_s1, %s4828_s17  ;;  %s41_s30 = int_to_ptr.vmem [resolvable:$true] %s40_s30 }
   0x7   :  { %p4832_p1 = scmp.lt.u32.totalorder %s4828_s17, %s5546_s1 }
   0x9   :  { %p4834_p2 = pnand %p4832_p1, %p4829_p0 }
   0xb   :  { %4837 = shalt.err (!%p4834_p2)
}
   0xc   :  { %s4838_s22 = scalar_lea.vmem %s41_s30, 256  ;;  %p4843_p4 = scmp.lt.s32.totalorder %s41_s30, %s41_s30 }
   0xd   :  { %p4839_p3 = scmp.ne.s32.totalorder %s41_s30, %s4838_s22  ;;  %p4844_p5 = scmp.lt.s32.totalorder %s4838_s22, %s4838_s22 }
   0xf   :  { %p4845_p6 = por %p4844_p5, %p4843_p4 }
  0x11   :  { %p4846_p7 = pnand %p4845_p6, %p4839_p3 }
  0x13   :  { %4849 = shalt.err (!%p4846_p7)
}
  0x14   :  { %s5039_s23 = smov 64   ;;  %s5040_s24 = smov 4  }
  0x15   :  { %46 = dma.hbm_to_vmem [thread:$0]  %s5546_s1, 256, %s41_s30, [#allocation6], %s5039_s23, %s5039_s23, %s5040_s24  }
  0x16   :  { %s5041_s27 = smov [#allocation8]   ;;  %s4850_s16 = scalar_lea.hbm %s5548_s3, 2048 }
  0x17   :  { %s62_s28 = sshll.u32 %s5041_s27, 4  ;;  %p4851_p8 = scmp.ne.s32.totalorder %s5548_s3, %s4850_s16  ;;  %s63_s28 = int_to_ptr.vmem [resolvable:$true] %s62_s28 }
  0x18   :  { %p4854_p9 = scmp.lt.u32.totalorder %s4850_s16, %s5548_s3 }
  0x1a   :  { %p4856_p10 = pnand %p4854_p9, %p4851_p8 }
  0x1c   :  { %4859 = shalt.err (!%p4856_p10)
}
  0x1d   :  { %s4860_s21 = scalar_lea.vmem %s63_s28, 2048  ;;  %p4865_p12 = scmp.lt.s32.totalorder %s63_s28, %s63_s28 }
  0x1e   :  { %p4861_p11 = scmp.ne.s32.totalorder %s63_s28, %s4860_s21  ;;  %p4866_p13 = scmp.lt.s32.totalorder %s4860_s21, %s4860_s21 }
  0x20   :  { %p4867_p0 = por %p4866_p13, %p4865_p12 }
  0x22   :  { %p4868_p1 = pnand %p4867_p0, %p4861_p11 }
  0x24   :  { %4871 = shalt.err (!%p4868_p1)
}
  0x25   :  { %s5042_s1 = smov 128   ;;  %s5043_s30 = smov 8  }
  0x26   :  { %68 = dma.hbm_to_vmem [thread:$0]  %s5548_s3, 2048, %s63_s28, [#allocation9], %s5042_s1, %s5042_s1, %s5043_s30  }
  0x27   :  { %s5044_s26 = smov [#allocation11]   ;;  %s4872_s16 = scalar_lea.hbm %s5554_s9, 32768 }
  0x28   :  { %s94_s27 = sshll.u32 %s5044_s26, 4  ;;  %p4873_p2 = scmp.ne.s32.totalorder %s5554_s9, %s4872_s16  ;;  %s95_s27 = int_to_ptr.vmem [resolvable:$true] %s94_s27 }
  0x29   :  { %p4876_p3 = scmp.lt.u32.totalorder %s4872_s16, %s5554_s9 }
  0x2b   :  { %p4878_p4 = pnand %p4876_p3, %p4873_p2 }
  0x2d   :  { %4881 = shalt.err (!%p4878_p4)
}
  0x2e   :  { %s4882_s21 = scalar_lea.vmem %s95_s27, 32768  ;;  %p4887_p6 = scmp.lt.s32.totalorder %s95_s27, %s95_s27 }
  0x2f   :  { %p4883_p5 = scmp.ne.s32.totalorder %s95_s27, %s4882_s21  ;;  %p4888_p7 = scmp.lt.s32.totalorder %s4882_s21, %s4882_s21 }
  0x31   :  { %p4889_p8 = por %p4888_p7, %p4887_p6 }
  0x33   :  { %p4890_p9 = pnand %p4889_p8, %p4883_p5 }
  0x35   :  { %4893 = shalt.err (!%p4890_p9)
}
  0x36   :  { %s5045_s3 = smov 512   ;;  %s5046_s28 = smov 32  }
  0x37   :  { %100 = dma.hbm_to_vmem [thread:$0]  %s5554_s9, 32768, %s95_s27, [#allocation12], %s5045_s3, %s5045_s3, %s5046_s28  }
  0x38   :  { %s5047_s22 = smov [#allocation2]   ;;  %s5048_s26 = smov [#allocation7]  }
  0x39   :  { %s31_s25 = sshll.u32 %s5047_s22, 4  ;;  %s53_s29 = sshll.u32 %s5048_s26, 4  ;;  %s32_s25 = int_to_ptr.vmem [resolvable:$true] %s31_s25  ;;  %s54_s29 = int_to_ptr.vmem [resolvable:$true] %s53_s29 }
  0x3a   :  { %s4894_s17 = scalar_lea.hbm %s5545_s0, 128 }
  0x3b   :  { %p4895_p10 = scmp.ne.s32.totalorder %s5545_s0, %s4894_s17  ;;  %p4898_p11 = scmp.lt.u32.totalorder %s4894_s17, %s5545_s0 }
  0x3d   :  { %p4900_p12 = pnand %p4898_p11, %p4895_p10 }
  0x3f   :  { %4903 = shalt.err (!%p4900_p12)
}
  0x40   :  { %s4904_s9 = scalar_lea.vmem %s32_s25, 128  ;;  %p4909_p0 = scmp.lt.s32.totalorder %s32_s25, %s32_s25 }
  0x41   :  { %p4905_p13 = scmp.ne.s32.totalorder %s32_s25, %s4904_s9  ;;  %p4910_p1 = scmp.lt.s32.totalorder %s4904_s9, %s4904_s9 }
  0x43   :  { %p4911_p2 = por %p4910_p1, %p4909_p0 }
  0x45   :  { %p4912_p3 = pnand %p4911_p2, %p4905_p13 }
  0x47   :  { %4915 = shalt.err (!%p4912_p3)
}
  0x48   :  { %34 = dma.hbm_to_vmem [thread:$0]  %s5545_s0, 128, %s32_s25, [#allocation3]  }
  0x49   :  { %s4916_s30 = scalar_lea.hbm %s5547_s2, 16 }
  0x4a   :  { %p4917_p4 = scmp.ne.s32.totalorder %s5547_s2, %s4916_s30  ;;  %p4920_p5 = scmp.lt.u32.totalorder %s4916_s30, %s5547_s2 }
  0x4c   :  { %p4922_p6 = pnand %p4920_p5, %p4917_p4 }
  0x4e   :  { %4925 = shalt.err (!%p4922_p6)
}
  0x4f   :  { %s4926_s17 = scalar_lea.vmem %s54_s29, 16  ;;  %s4930_s18 = scalar_lea.vmem %s54_s29, 32 }
  0x50   :  { %p4927_p7 = scmp.ne.s32.totalorder %s54_s29, %s4926_s17  ;;  %p4931_p8 = scmp.lt.s32.totalorder %s54_s29, %s54_s29 }
  0x51   :  { %p4932_p9 = scmp.lt.s32.totalorder %s4930_s18, %s4926_s17 }
  0x53   :  { %p4933_p10 = por %p4932_p9, %p4931_p8 }
  0x55   :  { %p4934_p11 = pnand %p4933_p10, %p4927_p7 }
  0x57   :  { %4937 = shalt.err (!%p4934_p11)
}
  0x58   :  { %56 = dma.hbm_to_vmem [thread:$0]  %s5547_s2, 16, %s54_s29, [#allocation6]  }
  0x59   :  { %s5049_s19 = smov [#allocation10]   ;;  %s4938_s27 = scalar_lea.hbm %s5551_s6, 8192 }
  0x5a   :  { %s78_s20 = sshll.u32 %s5049_s19, 4  ;;  %p4939_p12 = scmp.ne.s32.totalorder %s5551_s6, %s4938_s27  ;;  %s79_s20 = int_to_ptr.vmem [resolvable:$true] %s78_s20 }
  0x5b   :  { %p4942_p13 = scmp.lt.u32.totalorder %s4938_s27, %s5551_s6 }
  0x5d   :  { %p4944_p0 = pnand %p4942_p13, %p4939_p12 }
  0x5f   :  { %4947 = shalt.err (!%p4944_p0)
}
  0x60   :  { %s4948_s22 = scalar_lea.vmem %s79_s20, 8192  ;;  %p4953_p2 = scmp.lt.s32.totalorder %s79_s20, %s79_s20 }
  0x61   :  { %p4949_p1 = scmp.ne.s32.totalorder %s79_s20, %s4948_s22  ;;  %p4954_p3 = scmp.lt.s32.totalorder %s4948_s22, %s4948_s22 }
  0x63   :  { %p4955_p4 = por %p4954_p3, %p4953_p2 }
  0x65   :  { %p4956_p5 = pnand %p4955_p4, %p4949_p1 }
  0x67   :  { %4959 = shalt.err (!%p4956_p5)
}
  0x68   :  { %s5050_s2 = smov 256   ;;  %s5051_s29 = smov 16  }
  0x69   :  { %84 = dma.hbm_to_vmem [thread:$0]  %s5551_s6, 8192, %s79_s20, [#allocation9], %s5050_s2, %s5050_s2, %s5051_s29  }
  0x6a   :  { %s5052_s16 = smov [#allocation13]   ;;  %s5053_s18 = smov [#allocation14]  }
  0x6b   :  { %s110_s17 = sshll.u32 %s5052_s16, 4  ;;  %s123_s0 = sshll.u32 %s5053_s18, 4  ;;  %s111_s17 = int_to_ptr.vmem [resolvable:$true] %s110_s17  ;;  %s124_s0 = int_to_ptr.vmem [resolvable:$true] %s123_s0 }
  0x6c   :  { %s4960_s21 = scalar_lea.hbm %s5557_s12, 8192 }
  0x6d   :  { %p4961_p6 = scmp.ne.s32.totalorder %s5557_s12, %s4960_s21  ;;  %p4964_p7 = scmp.lt.u32.totalorder %s4960_s21, %s5557_s12 }
  0x6f   :  { %p4966_p8 = pnand %p4964_p7, %p4961_p6 }
  0x71   :  { %4969 = shalt.err (!%p4966_p8)
}
  0x72   :  { %s4970_s6 = scalar_lea.vmem %s111_s17, 8192  ;;  %p4975_p10 = scmp.lt.s32.totalorder %s111_s17, %s111_s17 }
  0x73   :  { %p4971_p9 = scmp.ne.s32.totalorder %s111_s17, %s4970_s6  ;;  %p4976_p11 = scmp.lt.s32.totalorder %s4970_s6, %s4970_s6 }
  0x75   :  { %p4977_p12 = por %p4976_p11, %p4975_p10 }
  0x77   :  { %p4978_p13 = pnand %p4977_p12, %p4971_p9 }
  0x79   :  { %4981 = shalt.err (!%p4978_p13)
}
  0x7a   :  { %116 = dma.hbm_to_vmem [thread:$0]  %s5557_s12, 8192, %s111_s17, [#allocation12], %s5039_s23, %s5039_s23, %s5040_s24  }
  0x7b   :  { %s4982_s2 = scalar_lea.hbm %s5558_s13, 16 }
  0x7c   :  { %p4983_p0 = scmp.ne.s32.totalorder %s5558_s13, %s4982_s2  ;;  %p4986_p1 = scmp.lt.u32.totalorder %s4982_s2, %s5558_s13 }
  0x7e   :  { %p4988_p2 = pnand %p4986_p1, %p4983_p0 }
  0x80   :  { %4991 = shalt.err (!%p4988_p2)
}
  0x81   :  { %s4992_s18 = scalar_lea.vmem %s124_s0, 16  ;;  %s4996_s25 = scalar_lea.vmem %s124_s0, 32 }
  0x82   :  { %p4993_p3 = scmp.ne.s32.totalorder %s124_s0, %s4992_s18  ;;  %p4997_p4 = scmp.lt.s32.totalorder %s124_s0, %s124_s0 }
  0x83   :  { %p4998_p5 = scmp.lt.s32.totalorder %s4996_s25, %s4992_s18 }
  0x85   :  { %p4999_p6 = por %p4998_p5, %p4997_p4 }
  0x87   :  { %p5000_p7 = pnand %p4999_p6, %p4993_p3 }
  0x89   :  { %5003 = shalt.err (!%p5000_p7)
}
  0x8a   :  { %126 = dma.hbm_to_vmem [thread:$0]  %s5558_s13, 16, %s124_s0, [#allocation15]  }
  0x8b   :  { %5026 = dma.done.wait [#allocation3], 128  }
  0x8c   :  { %5027 = vsyncadd [#allocation3], 4294967168 }
  0x8d   :  { %5028 = dma.done.wait [#allocation6], 272  }
  0x8e   :  { %5029 = vsyncadd [#allocation6], 4294967024 }
  0x8f   :  { %5030 = dma.done.wait [#allocation9], 10240  }
  0x90   :  { %5031 = vsyncadd [#allocation9], 4294957056 }
  0x91   :  { %5032 = dma.done.wait [#allocation12], 40960  }
  0x92   :  { %5033 = vsyncadd [#allocation12], 4294926336 }
  0x93   :  { %5034 = dma.done.wait [#allocation15], 16  }
  0x94   :  { %5035 = vsyncadd [#allocation15], 4294967280  ;;  %v5054_v0 = vmov 0.0   ;;  %vm5055_vm0 = vmmov 0   ;;  %v4612_v1 = vld [vmem:[#allocation5] sm:$0xff]   ;;  %v4613_v2 = vld [vmem:[#allocation5 + $0x8] sm:$0xff]  }
  0x95   :  { %4567 = vmatprep.subr.bf16.mxu0 %v5054_v0  ;;  %4571 = vmatprep.mubr.msk.bf16.mxu0 %vm5055_vm0, %v5054_v0  ;;  %v152_v3 = vld [vmem:[#allocation2] sm:$0xff]  ;;  %v4617_v6 = vld [vmem:[#allocation8 + $0x14] ss:$8 sps:$4 sm:$0xff]   ;;  %vm177_vm1 = vcmask 261120   ;;  %v4619_v8 = vld [vmem:[#allocation8 + $0x10] ss:$8 sps:$4 sm:$0xff]  }
  0x96   :  { %4568 = vmatpush3.bf16.msra.mxu0 %v4612_v1  ;;  %v4614_v4 = vld [vmem:[#allocation8 + $0x4] ss:$8 sps:$4 sm:$0xff]   ;;  %v4616_v5 = vld [vmem:[#allocation8] ss:$8 sps:$4 sm:$0xff]   ;;  %v153_v7 = vpack.c.bf16 %v152_v3, %v152_v3  ;;  %v4623_v11 = vld [vmem:[#allocation8 + $0x34] ss:$8 sps:$4 sm:$0xff]  }
  0x97   :  { %4569 = vmatprep.subr.bf16.mxu0 %v5054_v0  ;;  %320 = vmatprep.subr.bf16.mxu1 %v4614_v4  ;;  %v4620_v9 = vld [vmem:[#allocation8 + $0x24] ss:$8 sps:$4 sm:$0xff]   ;;  %v4622_v10 = vld [vmem:[#allocation8 + $0x20] ss:$8 sps:$4 sm:$0xff]   ;;  %v4625_v12 = vld [vmem:[#allocation8 + $0x30] ss:$8 sps:$4 sm:$0xff]  }
  0x98   :  { %321 = vmatpush1.bf16.msra.mxu1 %v4616_v5  ;;  %v4626_v13 = vld [vmem:[#allocation8 + $0x44] ss:$8 sps:$4 sm:$0xff]   ;;  %v4628_v14 = vld [vmem:[#allocation8 + $0x40] ss:$8 sps:$4 sm:$0xff]   ;;  %v4629_v15 = vld [vmem:[#allocation8 + $0x54] ss:$8 sps:$4 sm:$0xff]  }
  0x99   :  { %322 = vmatprep.subr.bf16.mxu1 %v4617_v6  ;;  %v4631_v16 = vld [vmem:[#allocation8 + $0x50] ss:$8 sps:$4 sm:$0xff]   ;;  %v4632_v17 = vld [vmem:[#allocation8 + $0x64] ss:$8 sps:$4 sm:$0xff]   ;;  %v4634_v18 = vld [vmem:[#allocation8 + $0x60] ss:$8 sps:$4 sm:$0xff]  }
  0x9a   :  { %4570 = vmatpush3.bf16.msra.mxu0 %v4613_v2  ;;  %v4635_v19 = vld [vmem:[#allocation8 + $0x74] ss:$8 sps:$4 sm:$0xff]   ;;  %v4637_v20 = vld [vmem:[#allocation8 + $0x70] ss:$8 sps:$4 sm:$0xff]   ;;  %v5056_v21 = vmov 0  }
  0x9b   :  { %352 = vmatprep.mubr.bf16.mxu1 %v5056_v21  ;;  %v4638_v22 = vld [vmem:[#allocation10] ss:$16 sps:$4 sm:$0xff]   ;;  %v4640_v23 = vld [vmem:[#allocation10 + $0x4] ss:$16 sps:$4 sm:$0xff]   ;;  %v4643_v24 = vld [vmem:[#allocation10 + $0xc] ss:$16 sps:$4 sm:$0xff]  }
  0x9c   :  { %323 = vmatpush1.bf16.msra.mxu1 %v4619_v8  ;;  %v4646_v25 = vld [vmem:[#allocation10 + $0x24] ss:$16 sps:$4 sm:$0xff]   ;;  %848 = vmatprep.subr.bf16.mxu0 %v4640_v23  ;;  %v4644_v26 = vld [vmem:[#allocation10 + $0x20] ss:$16 sps:$4 sm:$0xff]   ;;  %v4071_v27 = vld [vmem:[#allocation7] ss:$0 sm:$0xff] }
  0x9d   :  { %4572 = vmatmul.mubr.msk.bf16.vlgmr.msra.gmra.mrb[0].mxu0 %vm177_vm1, %v153_v7  ;;  %324 = vmatprep.subr.bf16.mxu1 %v4620_v9  ;;  %v4641_v35 = vld [vmem:[#allocation10 + $0x8] ss:$16 sps:$4 sm:$0xff]   ;;  %v4649_v37 = vld [vmem:[#allocation10 + $0x2c] ss:$16 sps:$4 sm:$0xff]   ;;  %v4652_v39 = vld [vmem:[#allocation10 + $0x44] ss:$16 sps:$4 sm:$0xff]  }
  0x9e   :  { %849 = vmatpush1.bf16.msra.mxu0 %v4638_v22  ;;  %v4647_v38 = vld [vmem:[#allocation10 + $0x28] ss:$16 sps:$4 sm:$0xff]   ;;  %v4655_v40 = vld [vmem:[#allocation10 + $0x4c] ss:$16 sps:$4 sm:$0xff]   ;;  %v4650_v41 = vld [vmem:[#allocation10 + $0x40] ss:$16 sps:$4 sm:$0xff]  }
  0x9f   :  { %850 = vmatprep.subr.bf16.mxu0 %v4646_v25  ;;  %v4653_v42 = vld [vmem:[#allocation10 + $0x48] ss:$16 sps:$4 sm:$0xff]   ;;  %v4658_v43 = vld [vmem:[#allocation10 + $0x64] ss:$16 sps:$4 sm:$0xff]   ;;  %v4661_v44 = vld [vmem:[#allocation10 + $0x6c] ss:$16 sps:$4 sm:$0xff]  }
  0xa0   :  { %325 = vmatpush1.bf16.msra.mxu1 %v4622_v10  ;;  %v4656_v45 = vld [vmem:[#allocation10 + $0x60] ss:$16 sps:$4 sm:$0xff]   ;;  %v4659_v46 = vld [vmem:[#allocation10 + $0x68] ss:$16 sps:$4 sm:$0xff]   ;;  %v4664_v47 = vld [vmem:[#allocation10 + $0x84] ss:$16 sps:$4 sm:$0xff]  }
  0xa1   :  { %326 = vmatprep.subr.bf16.mxu1 %v4623_v11  ;;  %v4667_v48 = vld [vmem:[#allocation10 + $0x8c] ss:$16 sps:$4 sm:$0xff]   ;;  %v4662_v49 = vld [vmem:[#allocation10 + $0x80] ss:$16 sps:$4 sm:$0xff]   ;;  %v4665_v50 = vld [vmem:[#allocation10 + $0x88] ss:$16 sps:$4 sm:$0xff]  }
  0xa2   :  { %851 = vmatpush1.bf16.msra.mxu0 %v4644_v26  ;;  %v4670_v51 = vld [vmem:[#allocation10 + $0xa4] ss:$16 sps:$4 sm:$0xff]   ;;  %v4673_v52 = vld [vmem:[#allocation10 + $0xac] ss:$16 sps:$4 sm:$0xff]   ;;  %v4668_v53 = vld [vmem:[#allocation10 + $0xa0] ss:$16 sps:$4 sm:$0xff]  }
  0xa3   :  { %852 = vmatprep.subr.bf16.mxu0 %v4652_v39  ;;  %v4671_v54 = vld [vmem:[#allocation10 + $0xa8] ss:$16 sps:$4 sm:$0xff]   ;;  %v4676_v55 = vld [vmem:[#allocation10 + $0xc4] ss:$16 sps:$4 sm:$0xff]   ;;  %v4679_v56 = vld [vmem:[#allocation10 + $0xcc] ss:$16 sps:$4 sm:$0xff]  }
  0xa4   :  { %327 = vmatpush1.bf16.msra.mxu1 %v4625_v12  ;;  %v4674_v57 = vld [vmem:[#allocation10 + $0xc0] ss:$16 sps:$4 sm:$0xff]   ;;  %v4677_v58 = vld [vmem:[#allocation10 + $0xc8] ss:$16 sps:$4 sm:$0xff]   ;;  %v4682_v59 = vld [vmem:[#allocation10 + $0xe4] ss:$16 sps:$4 sm:$0xff]  }
  0xa5   :  { %328 = vmatprep.subr.bf16.mxu1 %v4626_v13  ;;  %v4685_v60 = vld [vmem:[#allocation10 + $0xec] ss:$16 sps:$4 sm:$0xff]   ;;  %v4680_v61 = vld [vmem:[#allocation10 + $0xe0] ss:$16 sps:$4 sm:$0xff]   ;;  %v4683_v62 = vld [vmem:[#allocation10 + $0xe8] ss:$16 sps:$4 sm:$0xff]  }
  0xa6   :  { %853 = vmatpush1.bf16.msra.mxu0 %v4650_v41  ;;  %v4688_v63 = vld [vmem:[#allocation10 + $0x104] ss:$16 sps:$4 sm:$0xff]   ;;  %v4691_v0 = vld [vmem:[#allocation10 + $0x10c] ss:$16 sps:$4 sm:$0xff]   ;;  %v4686_v1 = vld [vmem:[#allocation10 + $0x100] ss:$16 sps:$4 sm:$0xff]  }
  0xa7   :  { %854 = vmatprep.subr.bf16.mxu0 %v4658_v43  ;;  %v4689_v2 = vld [vmem:[#allocation10 + $0x108] ss:$16 sps:$4 sm:$0xff]   ;;  %v4694_v3 = vld [vmem:[#allocation10 + $0x124] ss:$16 sps:$4 sm:$0xff]   ;;  %v4697_v4 = vld [vmem:[#allocation10 + $0x12c] ss:$16 sps:$4 sm:$0xff]  }
  0xa8   :  { %329 = vmatpush1.bf16.msra.mxu1 %v4628_v14  ;;  %v4692_v5 = vld [vmem:[#allocation10 + $0x120] ss:$16 sps:$4 sm:$0xff]   ;;  %v4695_v6 = vld [vmem:[#allocation10 + $0x128] ss:$16 sps:$4 sm:$0xff]   ;;  %v4700_v7 = vld [vmem:[#allocation10 + $0x144] ss:$16 sps:$4 sm:$0xff]  }
  0xa9   :  { %330 = vmatprep.subr.bf16.mxu1 %v4629_v15  ;;  %v4703_v8 = vld [vmem:[#allocation10 + $0x14c] ss:$16 sps:$4 sm:$0xff]   ;;  %v4698_v9 = vld [vmem:[#allocation10 + $0x140] ss:$16 sps:$4 sm:$0xff]   ;;  %v4701_v10 = vld [vmem:[#allocation10 + $0x148] ss:$16 sps:$4 sm:$0xff]  }
  0xaa   :  { %855 = vmatpush1.bf16.msra.mxu0 %v4656_v45  ;;  %v4706_v11 = vld [vmem:[#allocation10 + $0x164] ss:$16 sps:$4 sm:$0xff]   ;;  %v4709_v12 = vld [vmem:[#allocation10 + $0x16c] ss:$16 sps:$4 sm:$0xff]   ;;  %v4704_v13 = vld [vmem:[#allocation10 + $0x160] ss:$16 sps:$4 sm:$0xff]  }
  0xab   :  { %856 = vmatprep.subr.bf16.mxu0 %v4664_v47  ;;  %v4707_v14 = vld [vmem:[#allocation10 + $0x168] ss:$16 sps:$4 sm:$0xff]   ;;  %v4710_v15 = vld [vmem:[#allocation10 + $0x180] ss:$16 sps:$4 sm:$0xff]   ;;  %v4724_v23 = vld [vmem:[#allocation10 + $0x1c4] ss:$16 sps:$4 sm:$0xff]  }
  0xac   :  { %331 = vmatpush1.bf16.msra.mxu1 %v4631_v16  ;;  %v4712_v16 = vld [vmem:[#allocation10 + $0x184] ss:$16 sps:$4 sm:$0xff]   ;;  %v4716_v21 = vld [vmem:[#allocation10 + $0x1a0] ss:$16 sps:$4 sm:$0xff]   ;;  %v4719_v22 = vld [vmem:[#allocation10 + $0x1a8] ss:$16 sps:$4 sm:$0xff]  }
  0xad   :  { %332 = vmatprep.subr.bf16.mxu1 %v4632_v17  ;;  %v4713_v17 = vld [vmem:[#allocation10 + $0x188] ss:$16 sps:$4 sm:$0xff]   ;;  %v4722_v25 = vld [vmem:[#allocation10 + $0x1c0] ss:$16 sps:$4 sm:$0xff]  }
  0xae   :  { %857 = vmatpush1.bf16.msra.mxu0 %v4662_v49  ;;  %v4725_v26 = vld [vmem:[#allocation10 + $0x1c8] ss:$16 sps:$4 sm:$0xff]  }
  0xaf   :  { %858 = vmatprep.subr.bf16.mxu0 %v4670_v51 }
  0xb0   :  { %333 = vmatpush1.bf16.msra.mxu1 %v4634_v18  ;;  %v4715_v18 = vld [vmem:[#allocation10 + $0x18c] ss:$16 sps:$4 sm:$0xff]  }
  0xb1   :  { %334 = vmatprep.subr.bf16.mxu1 %v4635_v19  ;;  %v4718_v19 = vld [vmem:[#allocation10 + $0x1a4] ss:$16 sps:$4 sm:$0xff]  }
  0xb2   :  { %859 = vmatpush1.bf16.msra.mxu0 %v4668_v53 }
  0xb3   :  { %860 = vmatprep.subr.bf16.mxu0 %v4676_v55 }
  0xb4   :  { %335 = vmatpush1.bf16.msra.mxu1 %v4637_v20  ;;  %v4721_v20 = vld [vmem:[#allocation10 + $0x1ac] ss:$16 sps:$4 sm:$0xff]  }
  0xb5   :  { %889 = vmatprep.subr.bf16.mxu1 %v4643_v24  ;;  %v4727_v24 = vld [vmem:[#allocation10 + $0x1cc] ss:$16 sps:$4 sm:$0xff]  }
  0xb6   :  { %861 = vmatpush1.bf16.msra.mxu0 %v4674_v57 }
  0xb7   :  { %862 = vmatprep.subr.bf16.mxu0 %v4682_v59 }
  0xba   :  { %863 = vmatpush1.bf16.msra.mxu0 %v4680_v61 }
  0xbb   :  { %864 = vmatprep.subr.bf16.mxu0 %v4688_v63 }
  0xbe   :  { %865 = vmatpush1.bf16.msra.mxu0 %v4686_v1 }
  0xbf   :  { %866 = vmatprep.subr.bf16.mxu0 %v4694_v3 }
  0xc2   :  { %867 = vmatpush1.bf16.msra.mxu0 %v4692_v5 }
  0xc3   :  { %868 = vmatprep.subr.bf16.mxu0 %v4700_v7 }
  0xc6   :  { %869 = vmatpush1.bf16.msra.mxu0 %v4698_v9  ;;  %v402_v9 = vlaneseq }
  0xc7   :  { %870 = vmatprep.subr.bf16.mxu0 %v4706_v11 }
  0xca   :  { %871 = vmatpush1.bf16.msra.mxu0 %v4704_v13 }
  0xcb   :  { %872 = vmatprep.subr.bf16.mxu0 %v4712_v16 }
  0xce   :  { %873 = vmatpush1.bf16.msra.mxu0 %v4710_v15  ;;  %v5264_v15 = vshrl.u32 %v402_v9, 7 }
  0xcf   :  { %874 = vmatprep.subr.bf16.mxu0 %v4718_v19 }
  0xd0   :  { %v5273_v19 = vsub.s32 1, %v5264_v15 }
  0xd2   :  { %875 = vmatpush1.bf16.msra.mxu0 %v4716_v21 }
  0xd3   :  { %876 = vmatprep.subr.bf16.mxu0 %v4724_v23 }
  0xd6   :  { %877 = vmatpush1.bf16.msra.mxu0 %v4722_v25 }
 0x170   :  { %v215_v28 = vpop.f32.mrb[0].mxu0 }
 0x171   :  { %v216_v29 = vadd.f32 %v4071_v27, %v215_v28  ;;  %v4573_v30 = vpop.f32.mrb[1].mxu0  ;;  %v4730_v27 = vld [vmem:[#allocation10 + $0x1e4] ss:$16 sps:$4 sm:$0xff]   ;;  %v4733_v28 = vld [vmem:[#allocation10 + $0x1ec] ss:$16 sps:$4 sm:$0xff]  }
 0x172   :  { %v218_v31 = vpop.f32.mrb[2].mxu0  ;;  %v4731_v30 = vld [vmem:[#allocation10 + $0x1e8] ss:$16 sps:$4 sm:$0xff]   ;;  %878 = vmatprep.subr.bf16.mxu0 %v4730_v27 }
 0x173   :  { %v221_v32 = vmul.f32 0.2, %v216_v29  ;;  %v4574_v33 = vpop.f32.mrb[3].mxu0  ;;  %v5236_v31 = vld [vmem:[#allocation11] sm:$0xff] }
 0x174   :  { %v5240_v33 = vld [vmem:[#allocation11 + $0x8] sm:$0xff] }
 0x175   :  { %v222_v34 = vmax.f32 %v216_v29, %v221_v32  ;;  %v4728_v29 = vld [vmem:[#allocation10 + $0x1e0] ss:$16 sps:$4 sm:$0xff]  }
 0x176   :  { %879 = vmatpush1.bf16.msra.mxu0 %v4728_v29  ;;  %v5238_v32 = vld [vmem:[#allocation11 + $0x20] sm:$0xff] }
 0x177   :  { %v223_v36 = vpack.c.bf16 %v222_v34, %v222_v34  ;;  %v4155_v34 = vcombine.low %v5236_v31, %v5238_v32 }
 0x179   :  { %353 = vmatmul.mubr.bf16.vlgmr.msra.gmra.mrb[0].mxu1 %v223_v36  ;;  %v5246_v36 = vld [vmem:[#allocation11 + $0x28] sm:$0xff] }
 0x17a   :  { %890 = vmatpush1.bf16.msra.mxu1 %v4641_v35  ;;  %v4156_v35 = vcombine.high %v5236_v31, %v5238_v32  ;;  %v1148_v31 = vld [vmem:[#allocation11 + $0xc0] sm:$0xff] }
 0x17b   :  { %891 = vmatprep.subr.bf16.mxu1 %v4649_v37  ;;  %v4157_v37 = vcombine.low %v5240_v33, %v5246_v36  ;;  %v1152_v32 = vld [vmem:[#allocation11 + $0xe0] sm:$0xff] }
 0x17c   :  { %2660 = vmatprep.subr.bf16.mxu0 %v4156_v35 }
 0x17e   :  { %892 = vmatpush1.bf16.msra.mxu1 %v4647_v38  ;;  %v4158_v38 = vcombine.high %v5240_v33, %v5246_v36  ;;  %v1149_v33 = vld [vmem:[#allocation11 + $0xc8] sm:$0xff] }
 0x17f   :  { %893 = vmatprep.subr.bf16.mxu1 %v4655_v40  ;;  %v1153_v36 = vld [vmem:[#allocation11 + $0xe8] sm:$0xff] }
 0x180   :  { %v4181_v9 = vcombine.low %v1149_v33, %v1153_v36 }
 0x182   :  { %894 = vmatpush1.bf16.msra.mxu1 %v4653_v42 }
 0x183   :  { %895 = vmatprep.subr.bf16.mxu1 %v4661_v44 }
 0x186   :  { %896 = vmatpush1.bf16.msra.mxu1 %v4659_v46 }
 0x187   :  { %897 = vmatprep.subr.bf16.mxu1 %v4667_v48 }
 0x18a   :  { %898 = vmatpush1.bf16.msra.mxu1 %v4665_v50 }
 0x18b   :  { %899 = vmatprep.subr.bf16.mxu1 %v4673_v52 }
 0x18e   :  { %900 = vmatpush1.bf16.msra.mxu1 %v4671_v54 }
 0x18f   :  { %901 = vmatprep.subr.bf16.mxu1 %v4679_v56 }
 0x192   :  { %902 = vmatpush1.bf16.msra.mxu1 %v4677_v58 }
 0x193   :  { %903 = vmatprep.subr.bf16.mxu1 %v4685_v60 }
 0x196   :  { %904 = vmatpush1.bf16.msra.mxu1 %v4683_v62 }
 0x197   :  { %905 = vmatprep.subr.bf16.mxu1 %v4691_v0 }
 0x19a   :  { %906 = vmatpush1.bf16.msra.mxu1 %v4689_v2 }
 0x19b   :  { %907 = vmatprep.subr.bf16.mxu1 %v4697_v4 }
 0x19e   :  { %908 = vmatpush1.bf16.msra.mxu1 %v4695_v6 }
 0x19f   :  { %909 = vmatprep.subr.bf16.mxu1 %v4703_v8 }
 0x1a2   :  { %910 = vmatpush1.bf16.msra.mxu1 %v4701_v10 }
 0x1a3   :  { %911 = vmatprep.subr.bf16.mxu1 %v4709_v12 }
 0x1a6   :  { %912 = vmatpush1.bf16.msra.mxu1 %v4707_v14 }
 0x1a7   :  { %913 = vmatprep.subr.bf16.mxu1 %v4715_v18  ;;  %v361_v18 = vld [vmem:[%s5549_s4] sm:$0x3] }
 0x1a8   :  { %v409_v23 = vrot.slane %v361_v18, %v5273_v19 }
 0x1aa   :  { %914 = vmatpush1.bf16.msra.mxu1 %v4713_v17  ;;  %v5267_v17 = vsub.s32 0, %v5264_v15 }
 0x1ab   :  { %915 = vmatprep.subr.bf16.mxu1 %v4721_v20  ;;  %v5057_v20 = vmov 1966171168  }
 0x1ac   :  { %v420_v21 = vunpack.c.l.s4 %v5057_v20 }
 0x1ae   :  { %916 = vmatpush1.bf16.msra.mxu1 %v4719_v22  ;;  %v405_v22 = vrot.slane %v361_v18, %v5267_v17  ;;  %v421_v25 = vunpack.c.0.s8 %v420_v21 }
 0x1af   :  { %917 = vmatprep.subr.bf16.mxu1 %v4727_v24 }
 0x1b0   :  { %v5278_v35 = vsub.s32 %v421_v25, %v5264_v15 }
 0x1b2   :  { %918 = vmatpush1.bf16.msra.mxu1 %v4725_v26 }
 0x1b3   :  { %919 = vmatprep.subr.bf16.mxu1 %v4733_v28 }
 0x1b6   :  { %920 = vmatpush1.bf16.msra.mxu1 %v4731_v30 }
 0x1b7   :  { %2742 = vmatprep.subr.bf16.mxu1 %v4158_v38 }
 0x24c   :  { %v5252_v39 = vpop.f32.mrb[0].mxu1 }
 0x24d   :  { %v363_v40 = vrot.slane %v5252_v39, 4  ;;  %v375_v41 = vmul.f32 %v5252_v39, %v5252_v39  ;;  %v5257_v42 = vpop.f32.mrb[1].mxu1 }
 0x24e   :  { %v369_v43 = vrot.slane %v5257_v42, 4  ;;  %v376_v44 = vmul.f32 %v5257_v42, %v5257_v42  ;;  %v358_v45 = vpop.f32.mrb[2].mxu1 }
 0x24f   :  { %v364_v46 = vadd.f32 %v363_v40, %v5252_v39  ;;  %v377_v47 = vrot.slane %v375_v41, 4  ;;  %v359_v48 = vpop.f32.mrb[3].mxu1 }
 0x250   :  { %v370_v49 = vadd.f32 %v369_v43, %v5257_v42  ;;  %v383_v50 = vrot.slane %v376_v44, 4 }
 0x251   :  { %v365_v51 = vrot.slane %v364_v46, 2  ;;  %v378_v52 = vadd.f32 %v377_v47, %v375_v41  ;;  %v362_v41 = vld [vmem:[%s5550_s5] sm:$0x3] }
 0x252   :  { %v371_v53 = vrot.slane %v370_v49, 2  ;;  %v384_v54 = vadd.f32 %v383_v50, %v376_v44 }
 0x253   :  { %v366_v55 = vadd.f32 %v365_v51, %v364_v46  ;;  %v379_v56 = vrot.slane %v378_v52, 2 }
 0x254   :  { %v372_v57 = vadd.f32 %v371_v53, %v370_v49  ;;  %v385_v58 = vrot.slane %v384_v54, 2 }
 0x255   :  { %v367_v59 = vrot.slane %v366_v55, 1  ;;  %v380_v60 = vadd.f32 %v379_v56, %v378_v52 }
 0x256   :  { %v373_v61 = vrot.slane %v372_v57, 1  ;;  %v386_v62 = vadd.f32 %v385_v58, %v384_v54  ;;  %v1136_v58 = vld [vmem:[#allocation11 + $0x60] sm:$0xff] }
 0x257   :  { %v368_v63 = vadd.f32 %v367_v59, %v366_v55  ;;  %v381_v0 = vrot.slane %v380_v60, 1  ;;  %v1132_v55 = vld [vmem:[#allocation11 + $0x40] sm:$0xff]  ;;  %v1133_v59 = vld [vmem:[#allocation11 + $0x48] sm:$0xff] }
 0x258   :  { %v374_v1 = vadd.f32 %v373_v61, %v372_v57  ;;  %v387_v2 = vrot.slane %v386_v62, 1 }
 0x259   :  { %v382_v3 = vadd.f32 %v381_v0, %v380_v60  ;;  %v389_v4 = vmul.f32 0.125, %v368_v63  ;;  %v1137_v60 = vld [vmem:[#allocation11 + $0x68] sm:$0xff]  ;;  %v4164_v63 = vcombine.high %v1132_v55, %v1136_v58 }
 0x25a   :  { %v388_v5 = vadd.f32 %v387_v2, %v386_v62  ;;  %v390_v6 = vmul.f32 0.125, %v374_v1  ;;  %v4165_v0 = vcombine.low %v1133_v59, %v1137_v60  ;;  %v1140_v1 = vld [vmem:[#allocation11 + $0x80] sm:$0xff] }
 0x25b   :  { %v391_v7 = vmul.f32 0.125, %v382_v3  ;;  %v393_v8 = vmul.f32 %v389_v4, %v389_v4  ;;  %v1144_v2 = vld [vmem:[#allocation11 + $0xa0] sm:$0xff] }
 0x25c   :  { %v392_v10 = vmul.f32 0.125, %v388_v5  ;;  %v394_v11 = vmul.f32 %v390_v6, %v390_v6  ;;  %v4172_v3 = vcombine.high %v1140_v1, %v1144_v2  ;;  %v1145_v5 = vld [vmem:[#allocation11 + $0xa8] sm:$0xff] }
 0x25d   :  { %v395_v12 = vsub.f32 %v391_v7, %v393_v8 }
 0x25e   :  { %v396_v13 = vsub.f32 %v392_v10, %v394_v11  ;;  %v4182_v10 = vcombine.high %v1149_v33, %v1153_v36  ;;  %v1156_v11 = vld [vmem:[#allocation11 + $0x100] sm:$0xff] }
 0x25f   :  { %v397_v14 = vadd.f32 0.8, %v395_v12  ;;  %v1160_v12 = vld [vmem:[#allocation11 + $0x120] sm:$0xff] }
 0x260   :  { %v398_v16 = vadd.f32 0.8, %v396_v13  ;;  %v1157_v13 = vld [vmem:[#allocation11 + $0x108] sm:$0xff]  ;;  %v4187_v18 = vcombine.low %v1156_v11, %v1160_v12  ;;  %v1212_v36 = vld [vmem:[#allocation11 + $0x2c0] sm:$0xff] }
 0x261   :  { %4798 = vrsqrt.f32 %v397_v14  ;;  %v4188_v14 = vcombine.high %v1156_v11, %v1160_v12  ;;  %v1217_v11 = vld [vmem:[#allocation11 + $0x2e8] sm:$0xff] }
 0x262   :  { %4800 = vrsqrt.f32 %v398_v16  ;;  %v1161_v16 = vld [vmem:[#allocation11 + $0x128] sm:$0xff] }
 0x263   :  { %v4189_v20 = vcombine.low %v1157_v13, %v1161_v16  ;;  %v4190_v21 = vcombine.high %v1157_v13, %v1161_v16  ;;  %v1220_v16 = vld [vmem:[#allocation11 + $0x300] sm:$0xff] }
 0x26b   :  { %v4799_v24 = vpop.eup %4798 }
 0x26c   :  { %v4801_v26 = vpop.eup %4800  ;;  %v412_v27 = vmul.f32 %v4799_v24, %v405_v22  ;;  %v1164_v22 = vld [vmem:[#allocation11 + $0x140] sm:$0xff]  ;;  %v1165_v24 = vld [vmem:[#allocation11 + $0x148] sm:$0xff] }
 0x26d   :  { %v413_v28 = vmul.f32 %v4801_v26, %v409_v23  ;;  %v1168_v23 = vld [vmem:[#allocation11 + $0x160] sm:$0xff]  ;;  %v1169_v26 = vld [vmem:[#allocation11 + $0x168] sm:$0xff] }
 0x26e   :  { %v414_v29 = vmul.f32 %v412_v27, %v389_v4  ;;  %v438_v43 = vrot.slane %v412_v27, %v5267_v17  ;;  %v1141_v4 = vld [vmem:[#allocation11 + $0x88] sm:$0xff]  ;;  %v4196_v25 = vcombine.high %v1164_v22, %v1168_v23  ;;  %v4195_v27 = vcombine.low %v1164_v22, %v1168_v23 }
 0x26f   :  { %v415_v30 = vmul.f32 %v413_v28, %v390_v6  ;;  %v442_v44 = vrot.slane %v413_v28, %v5267_v17  ;;  %v4171_v6 = vcombine.low %v1140_v1, %v1144_v2  ;;  %v4173_v7 = vcombine.low %v1141_v4, %v1145_v5  ;;  %v1201_v1 = vld [vmem:[#allocation11 + $0x268] sm:$0xff] }
 0x270   :  { %v443_v47 = vmul.f32 %v438_v43, %v5252_v39  ;;  %v4166_v39 = vcombine.high %v1133_v59, %v1137_v60  ;;  %v4174_v8 = vcombine.high %v1141_v4, %v1145_v5  ;;  %v4197_v28 = vcombine.low %v1165_v24, %v1169_v26  ;;  %v1177_v43 = vld [vmem:[#allocation11 + $0x1a8] sm:$0xff]  ;;  %v1204_v5 = vld [vmem:[#allocation11 + $0x280] sm:$0xff] }
 0x271   :  { %v418_v38 = vcombine.low %v414_v29, %v415_v30  ;;  %v444_v48 = vmul.f32 %v442_v44, %v5257_v42  ;;  %v4163_v42 = vcombine.low %v1132_v55, %v1136_v58  ;;  %v4198_v29 = vcombine.high %v1165_v24, %v1169_v26  ;;  %v1172_v30 = vld [vmem:[#allocation11 + $0x180] sm:$0xff]  ;;  %v1193_v59 = vld [vmem:[#allocation11 + $0x228] sm:$0xff] }
 0x272   :  { %v1188_v55 = vld [vmem:[#allocation11 + $0x200] sm:$0xff]  ;;  %v1225_v22 = vld [vmem:[#allocation11 + $0x328] sm:$0xff] }
 0x273   :  { %v425_v40 = vrot.slane %v418_v38, %v5278_v35  ;;  %v1176_v38 = vld [vmem:[#allocation11 + $0x1a0] sm:$0xff] }
 0x274   :  { %v4203_v44 = vcombine.low %v1172_v30, %v1176_v38  ;;  %v1228_v26 = vld [vmem:[#allocation11 + $0x340] sm:$0xff] }
 0x275   :  { %v432_v45 = vrot.slane %v425_v40, %v5278_v35  ;;  %v1173_v40 = vld [vmem:[#allocation11 + $0x188] sm:$0xff] }
 0x277   :  { %v434_v46 = vsub.f32 %v362_v41, %v432_v45  ;;  %v4204_v41 = vcombine.high %v1172_v30, %v1176_v38  ;;  %v4205_v45 = vcombine.low %v1173_v40, %v1177_v43  ;;  %v1233_v30 = vld [vmem:[#allocation11 + $0x368] sm:$0xff] }
 0x279   :  { %v453_v49 = vrot.slane %v434_v46, %v5273_v19  ;;  %v449_v50 = vrot.slane %v434_v46, %v5267_v17  ;;  %v4206_v46 = vcombine.high %v1173_v40, %v1177_v43  ;;  %v1236_v43 = vld [vmem:[#allocation11 + $0x380] sm:$0xff] }
 0x27b   :  { %v457_v51 = vadd.f32 %v453_v49, %v444_v48  ;;  %v456_v52 = vadd.f32 %v449_v50, %v443_v47  ;;  %v1180_v47 = vld [vmem:[#allocation11 + $0x1c0] sm:$0xff]  ;;  %v1181_v49 = vld [vmem:[#allocation11 + $0x1c8] sm:$0xff] }
 0x27c   :  { %v1184_v48 = vld [vmem:[#allocation11 + $0x1e0] sm:$0xff] }
 0x27d   :  { %v459_v53 = vmul.f32 0.2, %v457_v51  ;;  %v458_v54 = vmul.f32 0.2, %v456_v52  ;;  %v4212_v50 = vcombine.high %v1180_v47, %v1184_v48 }
 0x27f   :  { %v461_v56 = vmax.f32 %v457_v51, %v459_v53  ;;  %v460_v57 = vmax.f32 %v456_v52, %v458_v54  ;;  %v1185_v51 = vld [vmem:[#allocation11 + $0x1e8] sm:$0xff]  ;;  %v4211_v52 = vcombine.low %v1180_v47, %v1184_v48 }
 0x280   :  { %v4213_v53 = vcombine.low %v1181_v49, %v1185_v51  ;;  %v4214_v54 = vcombine.high %v1181_v49, %v1185_v51  ;;  %v1241_v47 = vld [vmem:[#allocation11 + $0x3a8] sm:$0xff]  ;;  %v1244_v51 = vld [vmem:[#allocation11 + $0x3c0] sm:$0xff] }
 0x281   :  { %v463_v61 = vpack.c.bf16 %v461_v56, %v461_v56  ;;  %v462_v62 = vpack.c.bf16 %v460_v57, %v460_v57  ;;  %v1192_v56 = vld [vmem:[#allocation11 + $0x220] sm:$0xff]  ;;  %v1189_v57 = vld [vmem:[#allocation11 + $0x208] sm:$0xff] }
 0x282   :  { %v4220_v58 = vcombine.high %v1188_v55, %v1192_v56  ;;  %v4219_v60 = vcombine.low %v1188_v55, %v1192_v56  ;;  %v1249_v56 = vld [vmem:[#allocation11 + $0x3e8] sm:$0xff] }
 0x283   :  { %880 = vmatprep.mubr.bf16.mxu0 %v463_v61  ;;  %921 = vmatprep.mubr.bf16.mxu1 %v463_v61  ;;  %v4221_v61 = vcombine.low %v1189_v57, %v1193_v59 }
 0x284   :  { %881 = vmatmul.mubr.bf16.vlgmr.msra.gmra.mrb[4].mxu0 %v462_v62  ;;  %922 = vmatmul.mubr.bf16.vlgmr.msra.gmra.mrb[4].mxu1 %v462_v62  ;;  %v4222_v62 = vcombine.high %v1189_v57, %v1193_v59  ;;  %v5297_v59 = vld [vmem:[#allocation11 + $0x400] sm:$0xff] }
 0x285   :  { %2661 = vmatpush1.bf16.msra.mxu0 %v4155_v34  ;;  %2743 = vmatpush1.bf16.msra.mxu1 %v4157_v37  ;;  %v4180_v34 = vcombine.high %v1148_v31, %v1152_v32  ;;  %v4179_v37 = vcombine.low %v1148_v31, %v1152_v32  ;;  %v1209_v31 = vld [vmem:[#allocation11 + $0x2a8] sm:$0xff] }
 0x286   :  { %2662 = vmatprep.subr.bf16.mxu0 %v4164_v63  ;;  %2744 = vmatprep.subr.bf16.mxu1 %v4166_v39  ;;  %v1196_v63 = vld [vmem:[#allocation11 + $0x240] sm:$0xff] }
 0x287   :  { %v1200_v39 = vld [vmem:[#allocation11 + $0x260] sm:$0xff] }
 0x288   :  { %v4227_v2 = vcombine.low %v1196_v63, %v1200_v39 }
 0x289   :  { %2663 = vmatpush1.bf16.msra.mxu0 %v4163_v42  ;;  %2745 = vmatpush1.bf16.msra.mxu1 %v4165_v0  ;;  %v1197_v42 = vld [vmem:[#allocation11 + $0x248] sm:$0xff]  ;;  %v4228_v0 = vcombine.high %v1196_v63, %v1200_v39 }
 0x28a   :  { %2664 = vmatprep.subr.bf16.mxu0 %v4172_v3  ;;  %2746 = vmatprep.subr.bf16.mxu1 %v4174_v8  ;;  %v4229_v3 = vcombine.low %v1197_v42, %v1201_v1  ;;  %v4230_v4 = vcombine.high %v1197_v42, %v1201_v1  ;;  %v5305_v63 = vld [vmem:[#allocation11 + $0x428] sm:$0xff] }
 0x28d   :  { %2665 = vmatpush1.bf16.msra.mxu0 %v4171_v6  ;;  %2747 = vmatpush1.bf16.msra.mxu1 %v4173_v7  ;;  %v1208_v6 = vld [vmem:[#allocation11 + $0x2a0] sm:$0xff]  ;;  %v1205_v7 = vld [vmem:[#allocation11 + $0x288] sm:$0xff] }
 0x28e   :  { %2666 = vmatprep.subr.bf16.mxu0 %v4180_v34  ;;  %2748 = vmatprep.subr.bf16.mxu1 %v4182_v10  ;;  %v4236_v8 = vcombine.high %v1204_v5, %v1208_v6  ;;  %v4235_v32 = vcombine.low %v1204_v5, %v1208_v6  ;;  %v4237_v33 = vcombine.low %v1205_v7, %v1209_v31 }
 0x28f   :  { %v4238_v34 = vcombine.high %v1205_v7, %v1209_v31 }
 0x291   :  { %2667 = vmatpush1.bf16.msra.mxu0 %v4179_v37  ;;  %2749 = vmatpush1.bf16.msra.mxu1 %v4181_v9  ;;  %v1216_v37 = vld [vmem:[#allocation11 + $0x2e0] sm:$0xff]  ;;  %v1213_v9 = vld [vmem:[#allocation11 + $0x2c8] sm:$0xff] }
 0x292   :  { %2668 = vmatprep.subr.bf16.mxu0 %v4188_v14  ;;  %2750 = vmatprep.subr.bf16.mxu1 %v4190_v21  ;;  %v4244_v10 = vcombine.high %v1212_v36, %v1216_v37  ;;  %v4243_v12 = vcombine.low %v1212_v36, %v1216_v37  ;;  %v4245_v13 = vcombine.low %v1213_v9, %v1217_v11  ;;  %v1221_v21 = vld [vmem:[#allocation11 + $0x308] sm:$0xff] }
 0x293   :  { %v4246_v14 = vcombine.high %v1213_v9, %v1217_v11  ;;  %v4253_v24 = vcombine.low %v1221_v21, %v1225_v22 }
 0x295   :  { %2669 = vmatpush1.bf16.msra.mxu0 %v4187_v18  ;;  %2751 = vmatpush1.bf16.msra.mxu1 %v4189_v20  ;;  %v1224_v18 = vld [vmem:[#allocation11 + $0x320] sm:$0xff] }
 0x296   :  { %2670 = vmatprep.subr.bf16.mxu0 %v4196_v25  ;;  %2752 = vmatprep.subr.bf16.mxu1 %v4198_v29  ;;  %v4252_v20 = vcombine.high %v1220_v16, %v1224_v18  ;;  %v4251_v23 = vcombine.low %v1220_v16, %v1224_v18  ;;  %v4254_v25 = vcombine.high %v1221_v21, %v1225_v22 }
 0x299   :  { %2671 = vmatpush1.bf16.msra.mxu0 %v4195_v27  ;;  %2753 = vmatpush1.bf16.msra.mxu1 %v4197_v28  ;;  %v1232_v27 = vld [vmem:[#allocation11 + $0x360] sm:$0xff]  ;;  %v1229_v28 = vld [vmem:[#allocation11 + $0x348] sm:$0xff] }
 0x29a   :  { %2672 = vmatprep.subr.bf16.mxu0 %v4204_v41  ;;  %2754 = vmatprep.subr.bf16.mxu1 %v4206_v46  ;;  %v4260_v29 = vcombine.high %v1228_v26, %v1232_v27  ;;  %v4259_v38 = vcombine.low %v1228_v26, %v1232_v27  ;;  %v4261_v40 = vcombine.low %v1229_v28, %v1233_v30 }
 0x29b   :  { %v4262_v41 = vcombine.high %v1229_v28, %v1233_v30 }
 0x29d   :  { %2673 = vmatpush1.bf16.msra.mxu0 %v4203_v44  ;;  %2755 = vmatpush1.bf16.msra.mxu1 %v4205_v45  ;;  %v1240_v44 = vld [vmem:[#allocation11 + $0x3a0] sm:$0xff]  ;;  %v1237_v45 = vld [vmem:[#allocation11 + $0x388] sm:$0xff] }
 0x29e   :  { %2674 = vmatprep.subr.bf16.mxu0 %v4212_v50  ;;  %2756 = vmatprep.subr.bf16.mxu1 %v4214_v54  ;;  %v4268_v46 = vcombine.high %v1236_v43, %v1240_v44  ;;  %v4267_v48 = vcombine.low %v1236_v43, %v1240_v44  ;;  %v4269_v49 = vcombine.low %v1237_v45, %v1241_v47 }
 0x29f   :  { %v4270_v50 = vcombine.high %v1237_v45, %v1241_v47 }
 0x2a1   :  { %2675 = vmatpush1.bf16.msra.mxu0 %v4211_v52  ;;  %2757 = vmatpush1.bf16.msra.mxu1 %v4213_v53  ;;  %v1248_v52 = vld [vmem:[#allocation11 + $0x3e0] sm:$0xff]  ;;  %v1245_v53 = vld [vmem:[#allocation11 + $0x3c8] sm:$0xff] }
 0x2a2   :  { %2676 = vmatprep.subr.bf16.mxu0 %v4220_v58  ;;  %2758 = vmatprep.subr.bf16.mxu1 %v4222_v62  ;;  %v4275_v54 = vcombine.low %v1244_v51, %v1248_v52  ;;  %v4276_v55 = vcombine.high %v1244_v51, %v1248_v52  ;;  %v4277_v57 = vcombine.low %v1245_v53, %v1249_v56 }
 0x2a3   :  { %v4278_v58 = vcombine.high %v1245_v53, %v1249_v56 }
 0x2a5   :  { %2677 = vmatpush1.bf16.msra.mxu0 %v4219_v60  ;;  %2759 = vmatpush1.bf16.msra.mxu1 %v4221_v61  ;;  %v5299_v60 = vld [vmem:[#allocation11 + $0x420] sm:$0xff]  ;;  %v5301_v61 = vld [vmem:[#allocation11 + $0x408] sm:$0xff] }
 0x2a6   :  { %2678 = vmatprep.subr.bf16.mxu0 %v4228_v0  ;;  %2760 = vmatprep.subr.bf16.mxu1 %v4230_v4  ;;  %v4284_v62 = vcombine.high %v5297_v59, %v5299_v60  ;;  %v4283_v39 = vcombine.low %v5297_v59, %v5299_v60  ;;  %v4285_v42 = vcombine.low %v5301_v61, %v5305_v63 }
 0x2a7   :  { %v4286_v0 = vcombine.high %v5301_v61, %v5305_v63 }
 0x2a9   :  { %2679 = vmatpush1.bf16.msra.mxu0 %v4227_v2  ;;  %2761 = vmatpush1.bf16.msra.mxu1 %v4229_v3 }
 0x2aa   :  { %2680 = vmatprep.subr.bf16.mxu0 %v4236_v8  ;;  %2762 = vmatprep.subr.bf16.mxu1 %v4238_v34 }
 0x2ad   :  { %2681 = vmatpush1.bf16.msra.mxu0 %v4235_v32  ;;  %2763 = vmatpush1.bf16.msra.mxu1 %v4237_v33 }
 0x2ae   :  { %2682 = vmatprep.subr.bf16.mxu0 %v4244_v10  ;;  %2764 = vmatprep.subr.bf16.mxu1 %v4246_v14 }
 0x2b1   :  { %2683 = vmatpush1.bf16.msra.mxu0 %v4243_v12  ;;  %2765 = vmatpush1.bf16.msra.mxu1 %v4245_v13 }
 0x2b2   :  { %2684 = vmatprep.subr.bf16.mxu0 %v4252_v20  ;;  %2766 = vmatprep.subr.bf16.mxu1 %v4254_v25 }
 0x2b5   :  { %2685 = vmatpush1.bf16.msra.mxu0 %v4251_v23  ;;  %2767 = vmatpush1.bf16.msra.mxu1 %v4253_v24 }
 0x2b6   :  { %2686 = vmatprep.subr.bf16.mxu0 %v4260_v29  ;;  %2768 = vmatprep.subr.bf16.mxu1 %v4262_v41 }
 0x2b9   :  { %2687 = vmatpush1.bf16.msra.mxu0 %v4259_v38  ;;  %2769 = vmatpush1.bf16.msra.mxu1 %v4261_v40 }
 0x2ba   :  { %2688 = vmatprep.subr.bf16.mxu0 %v4268_v46  ;;  %2770 = vmatprep.subr.bf16.mxu1 %v4270_v50 }
 0x2bd   :  { %2689 = vmatpush1.bf16.msra.mxu0 %v4267_v48  ;;  %2771 = vmatpush1.bf16.msra.mxu1 %v4269_v49 }
 0x2be   :  { %2690 = vmatprep.subr.bf16.mxu0 %v4276_v55  ;;  %2772 = vmatprep.subr.bf16.mxu1 %v4278_v58 }
 0x2c1   :  { %2691 = vmatpush1.bf16.msra.mxu0 %v4275_v54  ;;  %2773 = vmatpush1.bf16.msra.mxu1 %v4277_v57 }
 0x2c2   :  { %2701 = vmatprep.subr.bf16.mxu0 %v4284_v62  ;;  %2783 = vmatprep.subr.bf16.mxu1 %v4286_v0 }
 0x357   :  { %v5313_v1 = vpop.f32.mrb[4].mxu0  ;;  %v5315_v2 = vpop.f32.mrb[4].mxu1 }
 0x358   :  { %v932_v3 = vrot.slane %v5313_v1, 4  ;;  %v956_v4 = vmul.f32 %v5313_v1, %v5313_v1  ;;  %v944_v5 = vrot.slane %v5315_v2, 4  ;;  %v958_v6 = vmul.f32 %v5315_v2, %v5315_v2  ;;  %v5323_v7 = vpop.f32.mrb[5].mxu0  ;;  %v5325_v8 = vpop.f32.mrb[5].mxu1 }
 0x359   :  { %v938_v31 = vrot.slane %v5323_v7, 4  ;;  %v957_v32 = vmul.f32 %v5323_v7, %v5323_v7  ;;  %v950_v33 = vrot.slane %v5325_v8, 4  ;;  %v959_v34 = vmul.f32 %v5325_v8, %v5325_v8  ;;  %v886_v36 = vpop.f32.mrb[6].mxu0  ;;  %v927_v37 = vpop.f32.mrb[6].mxu1 }
 0x35a   :  { %v933_v9 = vadd.f32 %v932_v3, %v5313_v1  ;;  %v960_v10 = vrot.slane %v956_v4, 4  ;;  %v945_v11 = vadd.f32 %v944_v5, %v5315_v2  ;;  %v972_v12 = vrot.slane %v958_v6, 4  ;;  %v887_v13 = vpop.f32.mrb[7].mxu0  ;;  %v928_v14 = vpop.f32.mrb[7].mxu1 }
 0x35b   :  { %v939_v16 = vadd.f32 %v938_v31, %v5323_v7  ;;  %v966_v18 = vrot.slane %v957_v32, 4  ;;  %v951_v20 = vadd.f32 %v950_v33, %v5325_v8  ;;  %v978_v21 = vrot.slane %v959_v34, 4 }
 0x35c   :  { %v934_v22 = vrot.slane %v933_v9, 2  ;;  %v961_v23 = vadd.f32 %v960_v10, %v956_v4  ;;  %v946_v24 = vrot.slane %v945_v11, 2  ;;  %v973_v25 = vadd.f32 %v972_v12, %v958_v6 }
 0x35d   :  { %v940_v26 = vrot.slane %v939_v16, 2  ;;  %v967_v27 = vadd.f32 %v966_v18, %v957_v32  ;;  %v952_v28 = vrot.slane %v951_v20, 2  ;;  %v979_v29 = vadd.f32 %v978_v21, %v959_v34 }
 0x35e   :  { %v935_v30 = vadd.f32 %v934_v22, %v933_v9  ;;  %v962_v38 = vrot.slane %v961_v23, 2  ;;  %v947_v40 = vadd.f32 %v946_v24, %v945_v11  ;;  %v974_v41 = vrot.slane %v973_v25, 2 }
 0x35f   :  { %v941_v43 = vadd.f32 %v940_v26, %v939_v16  ;;  %v968_v44 = vrot.slane %v967_v27, 2  ;;  %v953_v45 = vadd.f32 %v952_v28, %v951_v20  ;;  %v980_v46 = vrot.slane %v979_v29, 2  ;;  %v930_v28 = vld [vmem:[%s5552_s7] sm:$0xf] }
 0x360   :  { %v936_v47 = vrot.slane %v935_v30, 1  ;;  %v963_v48 = vadd.f32 %v962_v38, %v961_v23  ;;  %v948_v49 = vrot.slane %v947_v40, 1  ;;  %v975_v50 = vadd.f32 %v974_v41, %v973_v25 }
 0x361   :  { %v942_v51 = vrot.slane %v941_v43, 1  ;;  %v969_v52 = vadd.f32 %v968_v44, %v967_v27  ;;  %v954_v53 = vrot.slane %v953_v45, 1  ;;  %v981_v54 = vadd.f32 %v980_v46, %v979_v29 }
 0x362   :  { %v937_v55 = vadd.f32 %v936_v47, %v935_v30  ;;  %v964_v56 = vrot.slane %v963_v48, 1  ;;  %v949_v57 = vadd.f32 %v948_v49, %v947_v40  ;;  %v976_v58 = vrot.slane %v975_v50, 1 }
 0x363   :  { %v943_v62 = vadd.f32 %v942_v51, %v941_v43  ;;  %v970_v0 = vrot.slane %v969_v52, 1  ;;  %v955_v3 = vadd.f32 %v954_v53, %v953_v45  ;;  %v982_v4 = vrot.slane %v981_v54, 1 }
 0x364   :  { %v965_v5 = vadd.f32 %v964_v56, %v963_v48  ;;  %v984_v6 = vmul.f32 0.125, %v937_v55  ;;  %v977_v31 = vadd.f32 %v976_v58, %v975_v50  ;;  %v986_v32 = vmul.f32 0.125, %v949_v57 }
 0x365   :  { %v971_v33 = vadd.f32 %v970_v0, %v969_v52  ;;  %v985_v34 = vmul.f32 0.125, %v943_v62  ;;  %v983_v36 = vadd.f32 %v982_v4, %v981_v54  ;;  %v987_v37 = vmul.f32 0.125, %v955_v3 }
 0x366   :  { %v988_v9 = vmul.f32 0.125, %v965_v5  ;;  %v992_v10 = vmul.f32 %v984_v6, %v984_v6  ;;  %v990_v11 = vmul.f32 0.125, %v977_v31  ;;  %v994_v12 = vmul.f32 %v986_v32, %v986_v32  ;;  %v931_v31 = vld [vmem:[%s5553_s8] sm:$0xf] }
 0x367   :  { %v989_v13 = vmul.f32 0.125, %v971_v33  ;;  %v993_v14 = vmul.f32 %v985_v34, %v985_v34  ;;  %v991_v16 = vmul.f32 0.125, %v983_v36  ;;  %v995_v18 = vmul.f32 %v987_v37, %v987_v37 }
 0x368   :  { %v996_v20 = vsub.f32 %v988_v9, %v992_v10  ;;  %v998_v21 = vsub.f32 %v990_v11, %v994_v12  ;;  %v5341_v29 = vsub.s32 2, %v5264_v15  ;;  %v5344_v30 = vsub.s32 3, %v5264_v15 }
 0x369   :  { %v997_v22 = vsub.f32 %v989_v13, %v993_v14  ;;  %v999_v23 = vsub.f32 %v991_v16, %v995_v18  ;;  %v1012_v38 = vrot.slane %v930_v28, %v5267_v17  ;;  %v1016_v41 = vrot.slane %v930_v28, %v5273_v19 }
 0x36a   :  { %v1000_v24 = vadd.f32 0.8, %v996_v20  ;;  %v1002_v25 = vadd.f32 0.8, %v998_v21  ;;  %v1020_v40 = vrot.slane %v930_v28, %v5341_v29  ;;  %v1024_v44 = vrot.slane %v930_v28, %v5344_v30 }
 0x36b   :  { %v1001_v26 = vadd.f32 0.8, %v997_v22  ;;  %v1003_v27 = vadd.f32 0.8, %v999_v23  ;;  %v1260_v23 = vld [vmem:[#allocation11 + $0x440] sm:$0xff] }
 0x36c   :  { %4802 = vrsqrt.f32 %v1000_v24  ;;  %v1264_v24 = vld [vmem:[#allocation11 + $0x460] sm:$0xff] }
 0x36d   :  { %4804 = vrsqrt.f32 %v1002_v25  ;;  %v1261_v25 = vld [vmem:[#allocation11 + $0x448] sm:$0xff] }
 0x36e   :  { %4806 = vrsqrt.f32 %v1001_v26  ;;  %v1265_v26 = vld [vmem:[#allocation11 + $0x468] sm:$0xff] }
 0x36f   :  { %4808 = vrsqrt.f32 %v1003_v27 }
 0x376   :  { %v4803_v43 = vpop.eup %4802 }
 0x377   :  { %v4805_v45 = vpop.eup %4804  ;;  %v1029_v46 = vmul.f32 %v4803_v43, %v1012_v38  ;;  %v1268_v38 = vld [vmem:[#allocation11 + $0x480] sm:$0xff] }
 0x378   :  { %v4807_v47 = vpop.eup %4806  ;;  %v1031_v48 = vmul.f32 %v4805_v45, %v1020_v40  ;;  %v4292_v40 = vcombine.high %v1260_v23, %v1264_v24  ;;  %v1272_v43 = vld [vmem:[#allocation11 + $0x4a0] sm:$0xff]  ;;  %v1273_v45 = vld [vmem:[#allocation11 + $0x4a8] sm:$0xff] }
 0x379   :  { %v4809_v49 = vpop.eup %4808  ;;  %v1033_v50 = vmul.f32 %v1029_v46, %v984_v6  ;;  %v1030_v51 = vmul.f32 %v4807_v47, %v1016_v41  ;;  %v1070_v5 = vrot.slane %v1029_v46, %v5267_v17  ;;  %v4294_v41 = vcombine.high %v1261_v25, %v1265_v26 }
 0x37a   :  { %v1035_v52 = vmul.f32 %v1031_v48, %v986_v32  ;;  %v1078_v53 = vrot.slane %v1031_v48, %v5267_v17  ;;  %v1032_v54 = vmul.f32 %v4809_v49, %v1024_v44  ;;  %v1269_v44 = vld [vmem:[#allocation11 + $0x488] sm:$0xff]  ;;  %v4291_v47 = vcombine.low %v1260_v23, %v1264_v24  ;;  %v1320_v24 = vld [vmem:[#allocation11 + $0x620] sm:$0xff] }
 0x37b   :  { %v1034_v55 = vmul.f32 %v1030_v51, %v985_v34  ;;  %v1074_v6 = vrot.slane %v1030_v51, %v5267_v17  ;;  %v1083_v34 = vmul.f32 %v1070_v5, %v5313_v1  ;;  %v4293_v48 = vcombine.low %v1261_v25, %v1265_v26  ;;  %v1276_v51 = vld [vmem:[#allocation11 + $0x4c0] sm:$0xff]  ;;  %v1293_v5 = vld [vmem:[#allocation11 + $0x548] sm:$0xff] }
 0x37c   :  { %v1085_v56 = vmul.f32 %v1078_v53, %v5315_v2  ;;  %v1036_v57 = vmul.f32 %v1032_v54, %v987_v37  ;;  %v1082_v32 = vrot.slane %v1032_v54, %v5267_v17  ;;  %v4300_v49 = vcombine.high %v1268_v38, %v1272_v43  ;;  %v1277_v53 = vld [vmem:[#allocation11 + $0x4c8] sm:$0xff] }
 0x37d   :  { %v1041_v58 = vcombine.low %v1033_v50, %v1034_v55  ;;  %v1084_v36 = vmul.f32 %v1074_v6, %v5323_v7  ;;  %v4302_v50 = vcombine.high %v1269_v44, %v1273_v45  ;;  %v1281_v54 = vld [vmem:[#allocation11 + $0x4e8] sm:$0xff]  ;;  %v4299_v59 = vcombine.low %v1268_v38, %v1272_v43 }
 0x37e   :  { %v1042_v62 = vcombine.low %v1035_v52, %v1036_v57  ;;  %v1086_v37 = vmul.f32 %v1082_v32, %v5325_v8  ;;  %v1280_v52 = vld [vmem:[#allocation11 + $0x4e0] sm:$0xff]  ;;  %v4301_v60 = vcombine.low %v1269_v44, %v1273_v45  ;;  %v4310_v63 = vcombine.high %v1277_v53, %v1281_v54  ;;  %v1285_v55 = vld [vmem:[#allocation11 + $0x508] sm:$0xff] }
 0x37f   :  { %v1049_v0 = vrot.slane %v1041_v58, %v5278_v35  ;;  %v4308_v61 = vcombine.high %v1276_v51, %v1280_v52  ;;  %v4307_v57 = vcombine.low %v1276_v51, %v1280_v52  ;;  %v4309_v58 = vcombine.low %v1277_v53, %v1281_v54  ;;  %v1297_v6 = vld [vmem:[#allocation11 + $0x568] sm:$0xff]  ;;  %v1324_v44 = vld [vmem:[#allocation11 + $0x640] sm:$0xff] }
 0x380   :  { %v1056_v3 = vrot.slane %v1042_v62, %v5278_v35  ;;  %v1317_v25 = vld [vmem:[#allocation11 + $0x608] sm:$0xff]  ;;  %v1328_v45 = vld [vmem:[#allocation11 + $0x660] sm:$0xff] }
 0x381   :  { %v1321_v26 = vld [vmem:[#allocation11 + $0x628] sm:$0xff]  ;;  %v4356_v51 = vcombine.high %v1324_v44, %v1328_v45  ;;  %v1332_v53 = vld [vmem:[#allocation11 + $0x680] sm:$0xff] }
 0x382   :  { %v1057_v4 = vcombine.low %v1049_v0, %v1056_v3  ;;  %v1292_v3 = vld [vmem:[#allocation11 + $0x540] sm:$0xff]  ;;  %v4350_v43 = vcombine.high %v1317_v25, %v1321_v26 }
 0x383   :  { %v1336_v54 = vld [vmem:[#allocation11 + $0x6a0] sm:$0xff] }
 0x384   :  { %v1064_v2 = vrot.slane %v1057_v4, %v5278_v35  ;;  %v1296_v4 = vld [vmem:[#allocation11 + $0x560] sm:$0xff] }
 0x386   :  { %v1066_v33 = vsub.f32 %v931_v31, %v1064_v2  ;;  %v4324_v2 = vcombine.high %v1292_v3, %v1296_v4 }
 0x388   :  { %v1103_v9 = vrot.slane %v1066_v33, %v5344_v30  ;;  %v1095_v10 = vrot.slane %v1066_v33, %v5273_v19  ;;  %v1091_v11 = vrot.slane %v1066_v33, %v5267_v17  ;;  %v1099_v12 = vrot.slane %v1066_v33, %v5341_v29 }
 0x389   :  { %v4326_v33 = vcombine.high %v1293_v5, %v1297_v6 }
 0x38a   :  { %v1111_v13 = vadd.f32 %v1103_v9, %v1086_v37  ;;  %v1109_v14 = vadd.f32 %v1095_v10, %v1084_v36  ;;  %v1108_v16 = vadd.f32 %v1091_v11, %v1083_v34  ;;  %v5368_v18 = vadd.f32 %v1099_v12, %v1085_v56  ;;  %v1289_v56 = vld [vmem:[#allocation11 + $0x528] sm:$0xff]  ;;  %v1300_v34 = vld [vmem:[#allocation11 + $0x580] sm:$0xff] }
 0x38b   :  { %v4318_v0 = vcombine.high %v1285_v55, %v1289_v56  ;;  %v4317_v32 = vcombine.low %v1285_v55, %v1289_v56  ;;  %v1304_v36 = vld [vmem:[#allocation11 + $0x5a0] sm:$0xff]  ;;  %v1301_v37 = vld [vmem:[#allocation11 + $0x588] sm:$0xff]  ;;  %v4323_v10 = vcombine.low %v1292_v3, %v1296_v4  ;;  %v4325_v11 = vcombine.low %v1293_v5, %v1297_v6 }
 0x38c   :  { %v1115_v20 = vmul.f32 0.2, %v1111_v13  ;;  %v1113_v21 = vmul.f32 0.2, %v1109_v14  ;;  %v1112_v1 = vmul.f32 0.2, %v1108_v16  ;;  %v4332_v12 = vcombine.high %v1300_v34, %v1304_v36 }
 0x38d   :  { %v1305_v9 = vld [vmem:[#allocation11 + $0x5a8] sm:$0xff]  ;;  %v1340_v55 = vld [vmem:[#allocation11 + $0x6c0] sm:$0xff] }
 0x38e   :  { %v1117_v22 = vmax.f32 %v1109_v14, %v1113_v21  ;;  %v1116_v7 = vmax.f32 %v1108_v16, %v1112_v1  ;;  %v1119_v8 = vmax.f32 %v1111_v13, %v1115_v20  ;;  %v4334_v13 = vcombine.high %v1301_v37, %v1305_v9  ;;  %v1308_v14 = vld [vmem:[#allocation11 + $0x5c0] sm:$0xff]  ;;  %v1309_v20 = vld [vmem:[#allocation11 + $0x5c8] sm:$0xff] }
 0x38f   :  { %v1312_v16 = vld [vmem:[#allocation11 + $0x5e0] sm:$0xff]  ;;  %v1313_v21 = vld [vmem:[#allocation11 + $0x5e8] sm:$0xff]  ;;  %v4331_v1 = vcombine.low %v1300_v34, %v1304_v36 }
 0x390   :  { %v5370_v27 = vpack.c.bf16 %v1117_v22, %v1117_v22  ;;  %v5372_v28 = vpack.c.bf16 %v1116_v7, %v1116_v7  ;;  %v5378_v46 = vpack.c.bf16 %v1119_v8, %v1119_v8  ;;  %v4333_v22 = vcombine.low %v1301_v37, %v1305_v9  ;;  %v1316_v8 = vld [vmem:[#allocation11 + $0x600] sm:$0xff] }
 0x391   :  { %v4340_v7 = vcombine.high %v1308_v14, %v1312_v16  ;;  %v4342_v23 = vcombine.high %v1309_v20, %v1313_v21  ;;  %v4339_v38 = vcombine.low %v1308_v14, %v1312_v16  ;;  %v1344_v56 = vld [vmem:[#allocation11 + $0x6e0] sm:$0xff] }
 0x392   :  { %2692 = vmatprep.mubr.bf16.mxu0 %v5370_v27  ;;  %2774 = vmatprep.mubr.bf16.mxu1 %v5370_v27  ;;  %v4372_v3 = vcombine.high %v1340_v55, %v1344_v56  ;;  %v1348_v5 = vld [vmem:[#allocation11 + $0x700] sm:$0xff] }
 0x393   :  { %2693 = vmatmul.mubr.bf16.vlgmr.msra.gmra.mrb[8].mxu0 %v5372_v28  ;;  %2775 = vmatmul.mubr.bf16.vlgmr.msra.gmra.mrb[8].mxu1 %v5372_v28  ;;  %v1352_v6 = vld [vmem:[#allocation11 + $0x720] sm:$0xff] }
 0x394   :  { %2702 = vmatpush1.bf16.msra.mxu0 %v4283_v39  ;;  %2784 = vmatpush1.bf16.msra.mxu1 %v4285_v42  ;;  %v1284_v39 = vld [vmem:[#allocation11 + $0x500] sm:$0xff]  ;;  %v4380_v34 = vcombine.high %v1348_v5, %v1352_v6 }
 0x395   :  { %2733 = vmatprep.mubr.bf16.mxu0 %v5378_v46  ;;  %2815 = vmatprep.mubr.bf16.mxu1 %v5378_v46  ;;  %v1288_v42 = vld [vmem:[#allocation11 + $0x520] sm:$0xff] }
 0x396   :  { %2703 = vmatprep.subr.bf16.mxu0 %v4292_v40  ;;  %2785 = vmatprep.subr.bf16.mxu1 %v4294_v41  ;;  %v4316_v62 = vcombine.high %v1284_v39, %v1288_v42  ;;  %v4315_v31 = vcombine.low %v1284_v39, %v1288_v42  ;;  %v4341_v40 = vcombine.low %v1309_v20, %v1313_v21  ;;  %v1356_v37 = vld [vmem:[#allocation11 + $0x740] sm:$0xff] }
 0x397   :  { %v4348_v41 = vcombine.high %v1316_v8, %v1320_v24  ;;  %v4364_v39 = vcombine.high %v1332_v53, %v1336_v54  ;;  %v1360_v9 = vld [vmem:[#allocation11 + $0x760] sm:$0xff] }
 0x398   :  { %2704 = vmatpush1.bf16.msra.mxu0 %v4291_v47  ;;  %2786 = vmatpush1.bf16.msra.mxu1 %v4293_v48  ;;  %v1325_v47 = vld [vmem:[#allocation11 + $0x648] sm:$0xff]  ;;  %v4388_v14 = vcombine.high %v1356_v37, %v1360_v9  ;;  %v1364_v20 = vld [vmem:[#allocation11 + $0x780] sm:$0xff] }
 0x399   :  { %2705 = vmatprep.subr.bf16.mxu0 %v4300_v49  ;;  %2787 = vmatprep.subr.bf16.mxu1 %v4302_v50  ;;  %v1329_v48 = vld [vmem:[#allocation11 + $0x668] sm:$0xff]  ;;  %v4347_v49 = vcombine.low %v1316_v8, %v1320_v24  ;;  %v4349_v50 = vcombine.low %v1317_v25, %v1321_v26  ;;  %v1368_v21 = vld [vmem:[#allocation11 + $0x7a0] sm:$0xff] }
 0x39a   :  { %v4358_v52 = vcombine.high %v1325_v47, %v1329_v48  ;;  %v4396_v8 = vcombine.high %v1364_v20, %v1368_v21  ;;  %v1372_v25 = vld [vmem:[#allocation11 + $0x7c0] sm:$0xff] }
 0x39b   :  { %v1376_v26 = vld [vmem:[#allocation11 + $0x7e0] sm:$0xff] }
 0x39c   :  { %2706 = vmatpush1.bf16.msra.mxu0 %v4299_v59  ;;  %2788 = vmatpush1.bf16.msra.mxu1 %v4301_v60  ;;  %v1333_v59 = vld [vmem:[#allocation11 + $0x688] sm:$0xff] }
 0x39d   :  { %2707 = vmatprep.subr.bf16.mxu0 %v4308_v61  ;;  %2789 = vmatprep.subr.bf16.mxu1 %v4310_v63  ;;  %v1337_v60 = vld [vmem:[#allocation11 + $0x6a8] sm:$0xff]  ;;  %v4355_v61 = vcombine.low %v1324_v44, %v1328_v45  ;;  %v4357_v63 = vcombine.low %v1325_v47, %v1329_v48  ;;  %v4404_v44 = vcombine.high %v1372_v25, %v1376_v26  ;;  %v1114_v47 = vmul.f32 0.2, %v5368_v18  ;;  %v1126_v48 = vld [vmem:[#allocation11 + $0x10] sm:$0xff] }
 0x39e   :  { %v4366_v42 = vcombine.high %v1333_v59, %v1337_v60 }
 0x3a0   :  { %2708 = vmatpush1.bf16.msra.mxu0 %v4307_v57  ;;  %2790 = vmatpush1.bf16.msra.mxu1 %v4309_v58  ;;  %v1341_v57 = vld [vmem:[#allocation11 + $0x6c8] sm:$0xff] }
 0x3a1   :  { %2709 = vmatprep.subr.bf16.mxu0 %v4316_v62  ;;  %2791 = vmatprep.subr.bf16.mxu1 %v4318_v0  ;;  %v1345_v58 = vld [vmem:[#allocation11 + $0x6e8] sm:$0xff]  ;;  %v4363_v62 = vcombine.low %v1332_v53, %v1336_v54  ;;  %v4365_v0 = vcombine.low %v1333_v59, %v1337_v60  ;;  %v1118_v54 = vmax.f32 %v5368_v18, %v1114_v47  ;;  %v1143_v18 = vld [vmem:[#allocation11 + $0x98] sm:$0xff] }
 0x3a2   :  { %v4374_v4 = vcombine.high %v1341_v57, %v1345_v58 }
 0x3a4   :  { %2710 = vmatpush1.bf16.msra.mxu0 %v4315_v31  ;;  %2792 = vmatpush1.bf16.msra.mxu1 %v4317_v32  ;;  %v1349_v31 = vld [vmem:[#allocation11 + $0x708] sm:$0xff] }
 0x3a5   :  { %2711 = vmatprep.subr.bf16.mxu0 %v4324_v2  ;;  %2793 = vmatprep.subr.bf16.mxu1 %v4326_v33  ;;  %v1353_v32 = vld [vmem:[#allocation11 + $0x728] sm:$0xff]  ;;  %v4371_v2 = vcombine.low %v1340_v55, %v1344_v56  ;;  %v4373_v33 = vcombine.low %v1341_v57, %v1345_v58  ;;  %v5390_v56 = vpack.c.bf16 %v1118_v54, %v1118_v54 }
 0x3a6   :  { %v4382_v36 = vcombine.high %v1349_v31, %v1353_v32 }
 0x3a8   :  { %2712 = vmatpush1.bf16.msra.mxu0 %v4323_v10  ;;  %2794 = vmatpush1.bf16.msra.mxu1 %v4325_v11  ;;  %v1357_v10 = vld [vmem:[#allocation11 + $0x748] sm:$0xff] }
 0x3a9   :  { %2713 = vmatprep.subr.bf16.mxu0 %v4332_v12  ;;  %2795 = vmatprep.subr.bf16.mxu1 %v4334_v13  ;;  %v1361_v11 = vld [vmem:[#allocation11 + $0x768] sm:$0xff]  ;;  %v4379_v12 = vcombine.low %v1348_v5, %v1352_v6  ;;  %v4381_v13 = vcombine.low %v1349_v31, %v1353_v32 }
 0x3aa   :  { %v4390_v16 = vcombine.high %v1357_v10, %v1361_v11 }
 0x3ac   :  { %2714 = vmatpush1.bf16.msra.mxu0 %v4331_v1  ;;  %2796 = vmatpush1.bf16.msra.mxu1 %v4333_v22  ;;  %v1365_v1 = vld [vmem:[#allocation11 + $0x788] sm:$0xff] }
 0x3ad   :  { %2715 = vmatprep.subr.bf16.mxu0 %v4340_v7  ;;  %2797 = vmatprep.subr.bf16.mxu1 %v4342_v23  ;;  %v1369_v22 = vld [vmem:[#allocation11 + $0x7a8] sm:$0xff]  ;;  %v4387_v7 = vcombine.low %v1356_v37, %v1360_v9  ;;  %v4389_v23 = vcombine.low %v1357_v10, %v1361_v11 }
 0x3ae   :  { %v4398_v24 = vcombine.high %v1365_v1, %v1369_v22 }
 0x3b0   :  { %2716 = vmatpush1.bf16.msra.mxu0 %v4339_v38  ;;  %2798 = vmatpush1.bf16.msra.mxu1 %v4341_v40  ;;  %v1373_v38 = vld [vmem:[#allocation11 + $0x7c8] sm:$0xff] }
 0x3b1   :  { %2717 = vmatprep.subr.bf16.mxu0 %v4348_v41  ;;  %2799 = vmatprep.subr.bf16.mxu1 %v4350_v43  ;;  %v1377_v40 = vld [vmem:[#allocation11 + $0x7e8] sm:$0xff]  ;;  %v4395_v41 = vcombine.low %v1364_v20, %v1368_v21  ;;  %v4397_v43 = vcombine.low %v1365_v1, %v1369_v22  ;;  %v1166_v22 = vld [vmem:[#allocation11 + $0x150] sm:$0xff] }
 0x3b2   :  { %v4406_v45 = vcombine.high %v1373_v38, %v1377_v40  ;;  %v4405_v53 = vcombine.low %v1373_v38, %v1377_v40  ;;  %v1174_v40 = vld [vmem:[#allocation11 + $0x190] sm:$0xff] }
 0x3b4   :  { %2718 = vmatpush1.bf16.msra.mxu0 %v4347_v49  ;;  %2800 = vmatpush1.bf16.msra.mxu1 %v4349_v50  ;;  %v1130_v49 = vld [vmem:[#allocation11 + $0x30] sm:$0xff]  ;;  %v1127_v50 = vld [vmem:[#allocation11 + $0x18] sm:$0xff] }
 0x3b5   :  { %2719 = vmatprep.subr.bf16.mxu0 %v4356_v51  ;;  %2801 = vmatprep.subr.bf16.mxu1 %v4358_v52  ;;  %v1131_v51 = vld [vmem:[#allocation11 + $0x38] sm:$0xff]  ;;  %v4403_v52 = vcombine.low %v1372_v25, %v1376_v26  ;;  %v4160_v59 = vcombine.high %v1126_v48, %v1130_v49  ;;  %v4159_v55 = vcombine.low %v1126_v48, %v1130_v49 }
 0x3b6   :  { %v4162_v60 = vcombine.high %v1127_v50, %v1131_v51  ;;  %v4161_v57 = vcombine.low %v1127_v50, %v1131_v51  ;;  %v1182_v50 = vld [vmem:[#allocation11 + $0x1d0] sm:$0xff] }
 0x3b7   :  { %v1186_v51 = vld [vmem:[#allocation11 + $0x1f0] sm:$0xff] }
 0x3b8   :  { %2720 = vmatpush1.bf16.msra.mxu0 %v4355_v61  ;;  %2802 = vmatpush1.bf16.msra.mxu1 %v4357_v63  ;;  %v1134_v61 = vld [vmem:[#allocation11 + $0x50] sm:$0xff] }
 0x3b9   :  { %2721 = vmatprep.subr.bf16.mxu0 %v4364_v39  ;;  %2803 = vmatprep.subr.bf16.mxu1 %v4366_v42  ;;  %v1138_v63 = vld [vmem:[#allocation11 + $0x70] sm:$0xff]  ;;  %v1135_v39 = vld [vmem:[#allocation11 + $0x58] sm:$0xff] }
 0x3ba   :  { %v1139_v42 = vld [vmem:[#allocation11 + $0x78] sm:$0xff]  ;;  %v4168_v58 = vcombine.high %v1134_v61, %v1138_v63  ;;  %v4167_v5 = vcombine.low %v1134_v61, %v1138_v63  ;;  %v1190_v63 = vld [vmem:[#allocation11 + $0x210] sm:$0xff] }
 0x3bb   :  { %v4169_v6 = vcombine.low %v1135_v39, %v1139_v42 }
 0x3bc   :  { %2722 = vmatpush1.bf16.msra.mxu0 %v4363_v62  ;;  %2804 = vmatpush1.bf16.msra.mxu1 %v4365_v0  ;;  %v4170_v62 = vcombine.high %v1135_v39, %v1139_v42  ;;  %v1142_v0 = vld [vmem:[#allocation11 + $0x90] sm:$0xff]  ;;  %v1191_v42 = vld [vmem:[#allocation11 + $0x218] sm:$0xff] }
 0x3bd   :  { %2723 = vmatprep.subr.bf16.mxu0 %v4372_v3  ;;  %2805 = vmatprep.subr.bf16.mxu1 %v4374_v4  ;;  %v1146_v3 = vld [vmem:[#allocation11 + $0xb0] sm:$0xff]  ;;  %v1147_v4 = vld [vmem:[#allocation11 + $0xb8] sm:$0xff] }
 0x3be   :  { %v4176_v31 = vcombine.high %v1142_v0, %v1146_v3  ;;  %v4178_v32 = vcombine.high %v1143_v18, %v1147_v4  ;;  %v4175_v37 = vcombine.low %v1142_v0, %v1146_v3  ;;  %v4177_v9 = vcombine.low %v1143_v18, %v1147_v4  ;;  %v1194_v39 = vld [vmem:[#allocation11 + $0x230] sm:$0xff]  ;;  %v1199_v4 = vld [vmem:[#allocation11 + $0x258] sm:$0xff] }
 0x3bf   :  { %v1198_v3 = vld [vmem:[#allocation11 + $0x250] sm:$0xff] }
 0x3c0   :  { %2724 = vmatpush1.bf16.msra.mxu0 %v4371_v2  ;;  %2806 = vmatpush1.bf16.msra.mxu1 %v4373_v33  ;;  %v1150_v2 = vld [vmem:[#allocation11 + $0xd0] sm:$0xff] }
 0x3c1   :  { %2725 = vmatprep.subr.bf16.mxu0 %v4380_v34  ;;  %2807 = vmatprep.subr.bf16.mxu1 %v4382_v36  ;;  %v1154_v33 = vld [vmem:[#allocation11 + $0xf0] sm:$0xff]  ;;  %v1151_v34 = vld [vmem:[#allocation11 + $0xd8] sm:$0xff] }
 0x3c2   :  { %v1155_v36 = vld [vmem:[#allocation11 + $0xf8] sm:$0xff]  ;;  %v4184_v10 = vcombine.high %v1150_v2, %v1154_v33  ;;  %v1202_v18 = vld [vmem:[#allocation11 + $0x270] sm:$0xff] }
 0x3c3   :  { %v4186_v11 = vcombine.high %v1151_v34, %v1155_v36  ;;  %v4185_v20 = vcombine.low %v1151_v34, %v1155_v36  ;;  %v1210_v34 = vld [vmem:[#allocation11 + $0x2b0] sm:$0xff]  ;;  %v1207_v36 = vld [vmem:[#allocation11 + $0x298] sm:$0xff] }
 0x3c4   :  { %2726 = vmatpush1.bf16.msra.mxu0 %v4379_v12  ;;  %2808 = vmatpush1.bf16.msra.mxu1 %v4381_v13  ;;  %v1158_v12 = vld [vmem:[#allocation11 + $0x110] sm:$0xff] }
 0x3c5   :  { %2727 = vmatprep.subr.bf16.mxu0 %v4388_v14  ;;  %2809 = vmatprep.subr.bf16.mxu1 %v4390_v16  ;;  %v1162_v13 = vld [vmem:[#allocation11 + $0x130] sm:$0xff]  ;;  %v1163_v14 = vld [vmem:[#allocation11 + $0x138] sm:$0xff]  ;;  %v4183_v16 = vcombine.low %v1150_v2, %v1154_v33 }
 0x3c6   :  { %v4192_v21 = vcombine.high %v1158_v12, %v1162_v13  ;;  %v1206_v33 = vld [vmem:[#allocation11 + $0x290] sm:$0xff] }
 0x3c8   :  { %2728 = vmatpush1.bf16.msra.mxu0 %v4387_v7  ;;  %2810 = vmatpush1.bf16.msra.mxu1 %v4389_v23  ;;  %v1170_v7 = vld [vmem:[#allocation11 + $0x170] sm:$0xff]  ;;  %v1167_v23 = vld [vmem:[#allocation11 + $0x158] sm:$0xff] }
 0x3c9   :  { %2729 = vmatprep.subr.bf16.mxu0 %v4396_v8  ;;  %2811 = vmatprep.subr.bf16.mxu1 %v4398_v24  ;;  %v1171_v8 = vld [vmem:[#allocation11 + $0x178] sm:$0xff]  ;;  %v4191_v24 = vcombine.low %v1158_v12, %v1162_v13  ;;  %v4200_v26 = vcombine.high %v1166_v22, %v1170_v7  ;;  %v1214_v13 = vld [vmem:[#allocation11 + $0x2d0] sm:$0xff] }
 0x3ca   :  { %v4202_v38 = vcombine.high %v1167_v23, %v1171_v8  ;;  %v4201_v47 = vcombine.low %v1167_v23, %v1171_v8  ;;  %v1226_v23 = vld [vmem:[#allocation11 + $0x330] sm:$0xff]  ;;  %v1223_v8 = vld [vmem:[#allocation11 + $0x318] sm:$0xff] }
 0x3cc   :  { %2730 = vmatpush1.bf16.msra.mxu0 %v4395_v41  ;;  %2812 = vmatpush1.bf16.msra.mxu1 %v4397_v43  ;;  %v1178_v41 = vld [vmem:[#allocation11 + $0x1b0] sm:$0xff]  ;;  %v1175_v43 = vld [vmem:[#allocation11 + $0x198] sm:$0xff] }
 0x3cd   :  { %2731 = vmatprep.subr.bf16.mxu0 %v4404_v44  ;;  %2813 = vmatprep.subr.bf16.mxu1 %v4406_v45  ;;  %v1179_v44 = vld [vmem:[#allocation11 + $0x1b8] sm:$0xff]  ;;  %v4199_v45 = vcombine.low %v1166_v22, %v1170_v7  ;;  %v4208_v48 = vcombine.high %v1174_v40, %v1178_v41  ;;  %v4207_v54 = vcombine.low %v1174_v40, %v1178_v41  ;;  %v1222_v7 = vld [vmem:[#allocation11 + $0x310] sm:$0xff] }
 0x3ce   :  { %v4210_v49 = vcombine.high %v1175_v43, %v1179_v44  ;;  %v1230_v41 = vld [vmem:[#allocation11 + $0x350] sm:$0xff] }
 0x3d0   :  { %2732 = vmatpush1.bf16.msra.mxu0 %v4403_v52  ;;  %2814 = vmatpush1.bf16.msra.mxu1 %v4405_v53  ;;  %v1183_v52 = vld [vmem:[#allocation11 + $0x1d8] sm:$0xff] }
 0x3d1   :  { %2824 = vmatprep.subr.bf16.mxu0 %v4160_v59  ;;  %2906 = vmatprep.subr.bf16.mxu1 %v4162_v60  ;;  %v1187_v53 = vld [vmem:[#allocation11 + $0x1f8] sm:$0xff]  ;;  %v4209_v59 = vcombine.low %v1175_v43, %v1179_v44  ;;  %v4216_v60 = vcombine.high %v1182_v50, %v1186_v51  ;;  %v1234_v43 = vld [vmem:[#allocation11 + $0x370] sm:$0xff] }
 0x3d2   :  { %v4218_v61 = vcombine.high %v1183_v52, %v1187_v53  ;;  %v1231_v44 = vld [vmem:[#allocation11 + $0x358] sm:$0xff] }
 0x3d3   :  { %2734 = vmatmul.mubr.bf16.vlgmr.msra.gmra.mrb[8].mxu0 %v5390_v56  ;;  %2816 = vmatmul.mubr.bf16.vlgmr.msra.gmra.mrb[8].mxu1 %v5390_v56 }
 0x3d4   :  { %2825 = vmatpush1.bf16.msra.mxu0 %v4159_v55  ;;  %2856 = vmatprep.mubr.bf16.mxu0 %v5370_v27  ;;  %v1195_v55 = vld [vmem:[#allocation11 + $0x238] sm:$0xff] }
 0x3d5   :  { %2907 = vmatpush1.bf16.msra.mxu1 %v4161_v57  ;;  %2938 = vmatprep.mubr.bf16.mxu1 %v5370_v27  ;;  %v1159_v27 = vld [vmem:[#allocation11 + $0x118] sm:$0xff]  ;;  %v4215_v57 = vcombine.low %v1182_v50, %v1186_v51  ;;  %v4226_v0 = vcombine.high %v1191_v42, %v1195_v55  ;;  %v1238_v51 = vld [vmem:[#allocation11 + $0x390] sm:$0xff] }
 0x3d6   :  { %2826 = vmatprep.subr.bf16.mxu0 %v4168_v58  ;;  %2908 = vmatprep.subr.bf16.mxu1 %v4170_v62  ;;  %v4194_v1 = vcombine.high %v1159_v27, %v1163_v14  ;;  %v4193_v25 = vcombine.low %v1159_v27, %v1163_v14  ;;  %v4217_v58 = vcombine.low %v1183_v52, %v1187_v53  ;;  %v1218_v27 = vld [vmem:[#allocation11 + $0x2f0] sm:$0xff]  ;;  %v1215_v14 = vld [vmem:[#allocation11 + $0x2d8] sm:$0xff] }
 0x3d7   :  { %v4224_v62 = vcombine.high %v1190_v63, %v1194_v39  ;;  %v1242_v52 = vld [vmem:[#allocation11 + $0x3b0] sm:$0xff]  ;;  %v1239_v53 = vld [vmem:[#allocation11 + $0x398] sm:$0xff] }
 0x3d8   :  { %2827 = vmatpush1.bf16.msra.mxu0 %v4167_v5  ;;  %v1203_v5 = vld [vmem:[#allocation11 + $0x278] sm:$0xff] }
 0x3d9   :  { %2909 = vmatpush1.bf16.msra.mxu1 %v4169_v6  ;;  %2828 = vmatprep.subr.bf16.mxu0 %v4176_v31  ;;  %v4223_v6 = vcombine.low %v1190_v63, %v1194_v39  ;;  %v4225_v31 = vcombine.low %v1191_v42, %v1195_v55  ;;  %v4234_v2 = vcombine.high %v1199_v4, %v1203_v5  ;;  %v1246_v39 = vld [vmem:[#allocation11 + $0x3d0] sm:$0xff]  ;;  %v1247_v55 = vld [vmem:[#allocation11 + $0x3d8] sm:$0xff] }
 0x3da   :  { %2910 = vmatprep.subr.bf16.mxu1 %v4178_v32  ;;  %v4232_v32 = vcombine.high %v1198_v3, %v1202_v18  ;;  %v1250_v42 = vld [vmem:[#allocation11 + $0x3f0] sm:$0xff] }
 0x3dc   :  { %2829 = vmatpush1.bf16.msra.mxu0 %v4175_v37  ;;  %v1211_v37 = vld [vmem:[#allocation11 + $0x2b8] sm:$0xff] }
 0x3dd   :  { %2911 = vmatpush1.bf16.msra.mxu1 %v4177_v9  ;;  %2830 = vmatprep.subr.bf16.mxu0 %v4184_v10  ;;  %v4231_v9 = vcombine.low %v1198_v3, %v1202_v18  ;;  %v4233_v10 = vcombine.low %v1199_v4, %v1203_v5  ;;  %v4242_v12 = vcombine.high %v1207_v36, %v1211_v37  ;;  %v1254_v18 = vld [vmem:[#allocation11 + $0x410] sm:$0xff]  ;;  %v1255_v5 = vld [vmem:[#allocation11 + $0x418] sm:$0xff] }
 0x3de   :  { %2912 = vmatprep.subr.bf16.mxu1 %v4186_v11  ;;  %v4240_v11 = vcombine.high %v1206_v33, %v1210_v34  ;;  %v1258_v4 = vld [vmem:[#allocation11 + $0x430] sm:$0xff] }
 0x3e0   :  { %2831 = vmatpush1.bf16.msra.mxu0 %v4183_v16  ;;  %v1219_v16 = vld [vmem:[#allocation11 + $0x2f8] sm:$0xff] }
 0x3e1   :  { %2913 = vmatpush1.bf16.msra.mxu1 %v4185_v20  ;;  %2832 = vmatprep.subr.bf16.mxu0 %v4192_v21  ;;  %v4239_v20 = vcombine.low %v1206_v33, %v1210_v34  ;;  %v4241_v21 = vcombine.low %v1207_v36, %v1211_v37  ;;  %v4250_v22 = vcombine.high %v1215_v14, %v1219_v16  ;;  %v1262_v34 = vld [vmem:[#allocation11 + $0x450] sm:$0xff] }
 0x3e2   :  { %2914 = vmatprep.subr.bf16.mxu1 %v4194_v1  ;;  %v4248_v1 = vcombine.high %v1214_v13, %v1218_v27  ;;  %v1266_v36 = vld [vmem:[#allocation11 + $0x470] sm:$0xff]  ;;  %v4287_v37 = vcombine.low %v1254_v18, %v1258_v4 }
 0x3e4   :  { %2833 = vmatpush1.bf16.msra.mxu0 %v4191_v24  ;;  %v1227_v24 = vld [vmem:[#allocation11 + $0x338] sm:$0xff] }
 0x3e5   :  { %2915 = vmatpush1.bf16.msra.mxu1 %v4193_v25  ;;  %2834 = vmatprep.subr.bf16.mxu0 %v4200_v26  ;;  %v4247_v25 = vcombine.low %v1214_v13, %v1218_v27  ;;  %v4249_v26 = vcombine.low %v1215_v14, %v1219_v16  ;;  %v4258_v40 = vcombine.high %v1223_v8, %v1227_v24  ;;  %v1270_v13 = vld [vmem:[#allocation11 + $0x490] sm:$0xff]  ;;  %v1271_v16 = vld [vmem:[#allocation11 + $0x498] sm:$0xff] }
 0x3e6   :  { %2916 = vmatprep.subr.bf16.mxu1 %v4202_v38  ;;  %v4256_v38 = vcombine.high %v1222_v7, %v1226_v23  ;;  %v1274_v27 = vld [vmem:[#allocation11 + $0x4b0] sm:$0xff] }
 0x3e8   :  { %2835 = vmatpush1.bf16.msra.mxu0 %v4199_v45  ;;  %v1235_v45 = vld [vmem:[#allocation11 + $0x378] sm:$0xff] }
 0x3e9   :  { %2917 = vmatpush1.bf16.msra.mxu1 %v4201_v47  ;;  %2836 = vmatprep.subr.bf16.mxu0 %v4208_v48  ;;  %v4255_v47 = vcombine.low %v1222_v7, %v1226_v23  ;;  %v4257_v48 = vcombine.low %v1223_v8, %v1227_v24  ;;  %v4266_v50 = vcombine.high %v1231_v44, %v1235_v45  ;;  %v1278_v23 = vld [vmem:[#allocation11 + $0x4d0] sm:$0xff]  ;;  %v1279_v24 = vld [vmem:[#allocation11 + $0x4d8] sm:$0xff] }
 0x3ea   :  { %2918 = vmatprep.subr.bf16.mxu1 %v4210_v49  ;;  %v4264_v49 = vcombine.high %v1230_v41, %v1234_v43  ;;  %v1282_v8 = vld [vmem:[#allocation11 + $0x4f0] sm:$0xff] }
 0x3ec   :  { %2837 = vmatpush1.bf16.msra.mxu0 %v4207_v54  ;;  %v1243_v54 = vld [vmem:[#allocation11 + $0x3b8] sm:$0xff] }
 0x3ed   :  { %2919 = vmatpush1.bf16.msra.mxu1 %v4209_v59  ;;  %2838 = vmatprep.subr.bf16.mxu0 %v4216_v60  ;;  %v4263_v59 = vcombine.low %v1230_v41, %v1234_v43  ;;  %v4265_v60 = vcombine.low %v1231_v44, %v1235_v45  ;;  %v4274_v63 = vcombine.high %v1239_v53, %v1243_v54  ;;  %v1286_v41 = vld [vmem:[#allocation11 + $0x510] sm:$0xff]  ;;  %v1287_v44 = vld [vmem:[#allocation11 + $0x518] sm:$0xff] }
 0x3ee   :  { %2920 = vmatprep.subr.bf16.mxu1 %v4218_v61  ;;  %v4272_v61 = vcombine.high %v1238_v51, %v1242_v52  ;;  %v1290_v43 = vld [vmem:[#allocation11 + $0x530] sm:$0xff]  ;;  %v1291_v45 = vld [vmem:[#allocation11 + $0x538] sm:$0xff] }
 0x3f0   :  { %2839 = vmatpush1.bf16.msra.mxu0 %v4215_v57  ;;  %v1251_v57 = vld [vmem:[#allocation11 + $0x3f8] sm:$0xff] }
 0x3f1   :  { %2921 = vmatpush1.bf16.msra.mxu1 %v4217_v58  ;;  %2840 = vmatprep.subr.bf16.mxu0 %v4224_v62  ;;  %v4271_v58 = vcombine.low %v1238_v51, %v1242_v52  ;;  %v4273_v62 = vcombine.low %v1239_v53, %v1243_v54  ;;  %v4282_v3 = vcombine.high %v1247_v55, %v1251_v57  ;;  %v1298_v51 = vld [vmem:[#allocation11 + $0x570] sm:$0xff]  ;;  %v1295_v52 = vld [vmem:[#allocation11 + $0x558] sm:$0xff] }
 0x3f2   :  { %2922 = vmatprep.subr.bf16.mxu1 %v4226_v0  ;;  %v4280_v0 = vcombine.high %v1246_v39, %v1250_v42  ;;  %v1299_v53 = vld [vmem:[#allocation11 + $0x578] sm:$0xff]  ;;  %v4319_v54 = vcombine.low %v1286_v41, %v1290_v43 }
 0x3f4   :  { %2841 = vmatpush1.bf16.msra.mxu0 %v4223_v6  ;;  %v1259_v6 = vld [vmem:[#allocation11 + $0x438] sm:$0xff] }
 0x3f5   :  { %2923 = vmatpush1.bf16.msra.mxu1 %v4225_v31  ;;  %2842 = vmatprep.subr.bf16.mxu0 %v4232_v32  ;;  %v4279_v31 = vcombine.low %v1246_v39, %v1250_v42  ;;  %v4281_v32 = vcombine.low %v1247_v55, %v1251_v57  ;;  %v4290_v33 = vcombine.high %v1255_v5, %v1259_v6  ;;  %v1306_v39 = vld [vmem:[#allocation11 + $0x5b0] sm:$0xff]  ;;  %v1303_v42 = vld [vmem:[#allocation11 + $0x598] sm:$0xff] }
 0x3f6   :  { %2924 = vmatprep.subr.bf16.mxu1 %v4234_v2  ;;  %v4288_v2 = vcombine.high %v1254_v18, %v1258_v4  ;;  %v1307_v55 = vld [vmem:[#allocation11 + $0x5b8] sm:$0xff]  ;;  %v1314_v18 = vld [vmem:[#allocation11 + $0x5f0] sm:$0xff] }
 0x3f7   :  { %v1311_v4 = vld [vmem:[#allocation11 + $0x5d8] sm:$0xff] }
 0x3f8   :  { %2843 = vmatpush1.bf16.msra.mxu0 %v4231_v9  ;;  %v1263_v9 = vld [vmem:[#allocation11 + $0x458] sm:$0xff] }
 0x3f9   :  { %2925 = vmatpush1.bf16.msra.mxu1 %v4233_v10  ;;  %2844 = vmatprep.subr.bf16.mxu0 %v4240_v11  ;;  %v1267_v10 = vld [vmem:[#allocation11 + $0x478] sm:$0xff]  ;;  %v4289_v11 = vcombine.low %v1255_v5, %v1259_v6 }
 0x3fa   :  { %2926 = vmatprep.subr.bf16.mxu1 %v4242_v12  ;;  %v4296_v12 = vcombine.high %v1262_v34, %v1266_v36  ;;  %v4298_v14 = vcombine.high %v1263_v9, %v1267_v10  ;;  %v1315_v5 = vld [vmem:[#allocation11 + $0x5f8] sm:$0xff] }
 0x3fc   :  { %2845 = vmatpush1.bf16.msra.mxu0 %v4239_v20  ;;  %v1275_v20 = vld [vmem:[#allocation11 + $0x4b8] sm:$0xff] }
 0x3fd   :  { %2927 = vmatpush1.bf16.msra.mxu1 %v4241_v21  ;;  %2846 = vmatprep.subr.bf16.mxu0 %v4248_v1  ;;  %v4295_v21 = vcombine.low %v1262_v34, %v1266_v36  ;;  %v4297_v1 = vcombine.low %v1263_v9, %v1267_v10  ;;  %v4306_v7 = vcombine.high %v1271_v16, %v1275_v20  ;;  %v1322_v34 = vld [vmem:[#allocation11 + $0x630] sm:$0xff]  ;;  %v1319_v36 = vld [vmem:[#allocation11 + $0x618] sm:$0xff] }
 0x3fe   :  { %2928 = vmatprep.subr.bf16.mxu1 %v4250_v22  ;;  %v4304_v22 = vcombine.high %v1270_v13, %v1274_v27  ;;  %v4345_v10 = vcombine.low %v1311_v4, %v1315_v5 }
 0x400   :  { %2847 = vmatpush1.bf16.msra.mxu0 %v4247_v25  ;;  %v1283_v25 = vld [vmem:[#allocation11 + $0x4f8] sm:$0xff] }
 0x401   :  { %2929 = vmatpush1.bf16.msra.mxu1 %v4249_v26  ;;  %2848 = vmatprep.subr.bf16.mxu0 %v4256_v38  ;;  %v4303_v26 = vcombine.low %v1270_v13, %v1274_v27  ;;  %v4312_v38 = vcombine.high %v1278_v23, %v1282_v8  ;;  %v1326_v13 = vld [vmem:[#allocation11 + $0x650] sm:$0xff] }
 0x402   :  { %2930 = vmatprep.subr.bf16.mxu1 %v4258_v40  ;;  %v4314_v40 = vcombine.high %v1279_v24, %v1283_v25  ;;  %v1330_v27 = vld [vmem:[#allocation11 + $0x670] sm:$0xff] }
 0x404   :  { %2849 = vmatpush1.bf16.msra.mxu0 %v4255_v47  ;;  %v4313_v47 = vcombine.low %v1279_v24, %v1283_v25  ;;  %v1339_v24 = vld [vmem:[#allocation11 + $0x6b8] sm:$0xff]  ;;  %v4359_v25 = vcombine.low %v1326_v13, %v1330_v27 }
 0x405   :  { %2931 = vmatpush1.bf16.msra.mxu1 %v4257_v48  ;;  %2850 = vmatprep.subr.bf16.mxu0 %v4264_v49  ;;  %v4320_v48 = vcombine.high %v1286_v41, %v1290_v43  ;;  %v4322_v49 = vcombine.high %v1287_v44, %v1291_v45  ;;  %v1346_v41 = vld [vmem:[#allocation11 + $0x6f0] sm:$0xff]  ;;  %v1343_v43 = vld [vmem:[#allocation11 + $0x6d8] sm:$0xff] }
 0x406   :  { %2932 = vmatprep.subr.bf16.mxu1 %v4266_v50  ;;  %v1294_v50 = vld [vmem:[#allocation11 + $0x550] sm:$0xff] }
 0x407   :  { %v4327_v57 = vcombine.low %v1294_v50, %v1298_v51 }
 0x408   :  { %2851 = vmatpush1.bf16.msra.mxu0 %v4263_v59  ;;  %v4321_v59 = vcombine.low %v1287_v44, %v1291_v45  ;;  %v1347_v44 = vld [vmem:[#allocation11 + $0x6f8] sm:$0xff] }
 0x409   :  { %2933 = vmatpush1.bf16.msra.mxu1 %v4265_v60  ;;  %2852 = vmatprep.subr.bf16.mxu0 %v4272_v61  ;;  %v4328_v60 = vcombine.high %v1294_v50, %v1298_v51  ;;  %v4330_v61 = vcombine.high %v1295_v52, %v1299_v53  ;;  %v1354_v50 = vld [vmem:[#allocation11 + $0x730] sm:$0xff]  ;;  %v1351_v51 = vld [vmem:[#allocation11 + $0x718] sm:$0xff] }
 0x40a   :  { %2934 = vmatprep.subr.bf16.mxu1 %v4274_v63  ;;  %v1302_v63 = vld [vmem:[#allocation11 + $0x590] sm:$0xff] }
 0x40b   :  { %v4335_v6 = vcombine.low %v1302_v63, %v1306_v39 }
 0x40c   :  { %2853 = vmatpush1.bf16.msra.mxu0 %v4271_v58  ;;  %v4329_v58 = vcombine.low %v1295_v52, %v1299_v53  ;;  %v1355_v52 = vld [vmem:[#allocation11 + $0x738] sm:$0xff] }
 0x40d   :  { %2935 = vmatpush1.bf16.msra.mxu1 %v4273_v62  ;;  %2854 = vmatprep.subr.bf16.mxu0 %v4280_v0  ;;  %v4336_v62 = vcombine.high %v1302_v63, %v1306_v39  ;;  %v4338_v0 = vcombine.high %v1303_v42, %v1307_v55  ;;  %v1362_v63 = vld [vmem:[#allocation11 + $0x770] sm:$0xff]  ;;  %v1359_v39 = vld [vmem:[#allocation11 + $0x758] sm:$0xff] }
 0x40e   :  { %2936 = vmatprep.subr.bf16.mxu1 %v4282_v3  ;;  %v1310_v3 = vld [vmem:[#allocation11 + $0x5d0] sm:$0xff] }
 0x40f   :  { %v4343_v9 = vcombine.low %v1310_v3, %v1314_v18 }
 0x410   :  { %2855 = vmatpush1.bf16.msra.mxu0 %v4279_v31  ;;  %v4337_v31 = vcombine.low %v1303_v42, %v1307_v55  ;;  %v1363_v42 = vld [vmem:[#allocation11 + $0x778] sm:$0xff] }
 0x411   :  { %2937 = vmatpush1.bf16.msra.mxu1 %v4281_v32  ;;  %2865 = vmatprep.subr.bf16.mxu0 %v4288_v2  ;;  %v4344_v32 = vcombine.high %v1310_v3, %v1314_v18  ;;  %v4346_v2 = vcombine.high %v1311_v4, %v1315_v5  ;;  %v1370_v3 = vld [vmem:[#allocation11 + $0x7b0] sm:$0xff]  ;;  %v1367_v18 = vld [vmem:[#allocation11 + $0x798] sm:$0xff] }
 0x412   :  { %2947 = vmatprep.subr.bf16.mxu1 %v4290_v33  ;;  %v1318_v33 = vld [vmem:[#allocation11 + $0x610] sm:$0xff]  ;;  %v1371_v4 = vld [vmem:[#allocation11 + $0x7b8] sm:$0xff] }
 0x413   :  { %2857 = vmatmul.mubr.bf16.vlgmr.msra.gmra.mrb[12].mxu0 %v5372_v28 }
 0x414   :  { %2939 = vmatmul.mubr.bf16.vlgmr.msra.gmra.mrb[12].mxu1 %v5372_v28  ;;  %2866 = vmatpush1.bf16.msra.mxu0 %v4287_v37  ;;  %v4305_v28 = vcombine.low %v1271_v16, %v1275_v20  ;;  %v1323_v37 = vld [vmem:[#allocation11 + $0x638] sm:$0xff]  ;;  %v4351_v20 = vcombine.low %v1318_v33, %v1322_v34 }
 0x415   :  { %2897 = vmatprep.mubr.bf16.mxu0 %v5378_v46  ;;  %2948 = vmatpush1.bf16.msra.mxu1 %v4289_v11  ;;  %v4352_v11 = vcombine.high %v1318_v33, %v1322_v34  ;;  %v1331_v16 = vld [vmem:[#allocation11 + $0x678] sm:$0xff]  ;;  %v1378_v33 = vld [vmem:[#allocation11 + $0x7f0] sm:$0xff] }
 0x416   :  { %2979 = vmatprep.mubr.bf16.mxu1 %v5378_v46  ;;  %2867 = vmatprep.subr.bf16.mxu0 %v4296_v12  ;;  %v4311_v46 = vcombine.low %v1278_v23, %v1282_v8  ;;  %v4354_v12 = vcombine.high %v1319_v36, %v1323_v37  ;;  %v1338_v23 = vld [vmem:[#allocation11 + $0x6b0] sm:$0xff]  ;;  %v1335_v8 = vld [vmem:[#allocation11 + $0x698] sm:$0xff] }
 0x417   :  { %2949 = vmatprep.subr.bf16.mxu1 %v4298_v14  ;;  %v1327_v14 = vld [vmem:[#allocation11 + $0x658] sm:$0xff] }
 0x418   :  { %2868 = vmatpush1.bf16.msra.mxu0 %v4295_v21  ;;  %v4353_v21 = vcombine.low %v1319_v36, %v1323_v37  ;;  %v1375_v34 = vld [vmem:[#allocation11 + $0x7d8] sm:$0xff] }
 0x419   :  { %2950 = vmatpush1.bf16.msra.mxu1 %v4297_v1  ;;  %2869 = vmatprep.subr.bf16.mxu0 %v4304_v22  ;;  %v4360_v1 = vcombine.high %v1326_v13, %v1330_v27  ;;  %v4362_v22 = vcombine.high %v1327_v14, %v1331_v16  ;;  %v1379_v36 = vld [vmem:[#allocation11 + $0x7f8] sm:$0xff] }
 0x41a   :  { %2951 = vmatprep.subr.bf16.mxu1 %v4306_v7  ;;  %v1334_v7 = vld [vmem:[#allocation11 + $0x690] sm:$0xff]  ;;  %v4409_v13 = vcombine.low %v1375_v34, %v1379_v36 }
 0x41b   :  { %v4367_v45 = vcombine.low %v1334_v7, %v1338_v23 }
 0x41c   :  { %2870 = vmatpush1.bf16.msra.mxu0 %v4303_v26  ;;  %v4361_v26 = vcombine.low %v1327_v14, %v1331_v16 }
 0x41d   :  { %2952 = vmatpush1.bf16.msra.mxu1 %v4305_v28  ;;  %2871 = vmatprep.subr.bf16.mxu0 %v4312_v38  ;;  %v4368_v28 = vcombine.high %v1334_v7, %v1338_v23  ;;  %v4370_v38 = vcombine.high %v1335_v8, %v1339_v24 }
 0x41e   :  { %2953 = vmatprep.subr.bf16.mxu1 %v4314_v40  ;;  %v1342_v40 = vld [vmem:[#allocation11 + $0x6d0] sm:$0xff] }
 0x41f   :  { %v4375_v53 = vcombine.low %v1342_v40, %v1346_v41 }
 0x420   :  { %2872 = vmatpush1.bf16.msra.mxu0 %v4311_v46  ;;  %v4369_v46 = vcombine.low %v1335_v8, %v1339_v24 }
 0x421   :  { %2954 = vmatpush1.bf16.msra.mxu1 %v4313_v47  ;;  %2873 = vmatprep.subr.bf16.mxu0 %v4320_v48  ;;  %v4376_v47 = vcombine.high %v1342_v40, %v1346_v41  ;;  %v4378_v48 = vcombine.high %v1343_v43, %v1347_v44 }
 0x422   :  { %2955 = vmatprep.subr.bf16.mxu1 %v4322_v49  ;;  %v1350_v49 = vld [vmem:[#allocation11 + $0x710] sm:$0xff] }
 0x423   :  { %v4383_v55 = vcombine.low %v1350_v49, %v1354_v50 }
 0x424   :  { %2874 = vmatpush1.bf16.msra.mxu0 %v4319_v54  ;;  %v4377_v54 = vcombine.low %v1343_v43, %v1347_v44 }
 0x425   :  { %2956 = vmatpush1.bf16.msra.mxu1 %v4321_v59  ;;  %2875 = vmatprep.subr.bf16.mxu0 %v4328_v60  ;;  %v4384_v59 = vcombine.high %v1350_v49, %v1354_v50  ;;  %v4386_v60 = vcombine.high %v1351_v51, %v1355_v52 }
 0x426   :  { %2957 = vmatprep.subr.bf16.mxu1 %v4330_v61  ;;  %v1358_v61 = vld [vmem:[#allocation11 + $0x750] sm:$0xff] }
 0x427   :  { %v4391_v5 = vcombine.low %v1358_v61, %v1362_v63 }
 0x428   :  { %2876 = vmatpush1.bf16.msra.mxu0 %v4327_v57  ;;  %v4385_v57 = vcombine.low %v1351_v51, %v1355_v52 }
 0x429   :  { %2958 = vmatpush1.bf16.msra.mxu1 %v4329_v58  ;;  %2877 = vmatprep.subr.bf16.mxu0 %v4336_v62  ;;  %v4392_v58 = vcombine.high %v1358_v61, %v1362_v63  ;;  %v4394_v62 = vcombine.high %v1359_v39, %v1363_v42 }
 0x42a   :  { %2959 = vmatprep.subr.bf16.mxu1 %v4338_v0  ;;  %v1366_v0 = vld [vmem:[#allocation11 + $0x790] sm:$0xff] }
 0x42b   :  { %v4399_v37 = vcombine.low %v1366_v0, %v1370_v3 }
 0x42c   :  { %2878 = vmatpush1.bf16.msra.mxu0 %v4335_v6  ;;  %v4393_v6 = vcombine.low %v1359_v39, %v1363_v42 }
 0x42d   :  { %2960 = vmatpush1.bf16.msra.mxu1 %v4337_v31  ;;  %2879 = vmatprep.subr.bf16.mxu0 %v4344_v32  ;;  %v4400_v31 = vcombine.high %v1366_v0, %v1370_v3  ;;  %v4402_v32 = vcombine.high %v1367_v18, %v1371_v4 }
 0x42e   :  { %2961 = vmatprep.subr.bf16.mxu1 %v4346_v2  ;;  %v1374_v2 = vld [vmem:[#allocation11 + $0x7d0] sm:$0xff] }
 0x430   :  { %2880 = vmatpush1.bf16.msra.mxu0 %v4343_v9  ;;  %v4401_v9 = vcombine.low %v1367_v18, %v1371_v4 }
 0x431   :  { %2962 = vmatpush1.bf16.msra.mxu1 %v4345_v10  ;;  %2881 = vmatprep.subr.bf16.mxu0 %v4352_v11  ;;  %v4408_v10 = vcombine.high %v1374_v2, %v1378_v33  ;;  %v4410_v11 = vcombine.high %v1375_v34, %v1379_v36 }
 0x432   :  { %2963 = vmatprep.subr.bf16.mxu1 %v4354_v12  ;;  %v4407_v12 = vcombine.low %v1374_v2, %v1378_v33 }
 0x434   :  { %2882 = vmatpush1.bf16.msra.mxu0 %v4351_v20 }
 0x435   :  { %2964 = vmatpush1.bf16.msra.mxu1 %v4353_v21  ;;  %2883 = vmatprep.subr.bf16.mxu0 %v4360_v1 }
 0x436   :  { %2965 = vmatprep.subr.bf16.mxu1 %v4362_v22 }
 0x438   :  { %2884 = vmatpush1.bf16.msra.mxu0 %v4359_v25 }
 0x439   :  { %2966 = vmatpush1.bf16.msra.mxu1 %v4361_v26  ;;  %2885 = vmatprep.subr.bf16.mxu0 %v4368_v28 }
 0x43a   :  { %2967 = vmatprep.subr.bf16.mxu1 %v4370_v38 }
 0x43c   :  { %2886 = vmatpush1.bf16.msra.mxu0 %v4367_v45 }
 0x43d   :  { %2968 = vmatpush1.bf16.msra.mxu1 %v4369_v46  ;;  %2887 = vmatprep.subr.bf16.mxu0 %v4376_v47 }
 0x43e   :  { %2969 = vmatprep.subr.bf16.mxu1 %v4378_v48 }
 0x440   :  { %2888 = vmatpush1.bf16.msra.mxu0 %v4375_v53 }
 0x441   :  { %2970 = vmatpush1.bf16.msra.mxu1 %v4377_v54  ;;  %2889 = vmatprep.subr.bf16.mxu0 %v4384_v59 }
 0x442   :  { %2971 = vmatprep.subr.bf16.mxu1 %v4386_v60 }
 0x444   :  { %2890 = vmatpush1.bf16.msra.mxu0 %v4383_v55 }
 0x445   :  { %2972 = vmatpush1.bf16.msra.mxu1 %v4385_v57  ;;  %2891 = vmatprep.subr.bf16.mxu0 %v4392_v58 }
 0x446   :  { %2973 = vmatprep.subr.bf16.mxu1 %v4394_v62 }
 0x448   :  { %2892 = vmatpush1.bf16.msra.mxu0 %v4391_v5 }
 0x449   :  { %2974 = vmatpush1.bf16.msra.mxu1 %v4393_v6  ;;  %2893 = vmatprep.subr.bf16.mxu0 %v4400_v31 }
 0x44a   :  { %2975 = vmatprep.subr.bf16.mxu1 %v4402_v32 }
 0x44c   :  { %2894 = vmatpush1.bf16.msra.mxu0 %v4399_v37 }
 0x44d   :  { %2976 = vmatpush1.bf16.msra.mxu1 %v4401_v9  ;;  %2895 = vmatprep.subr.bf16.mxu0 %v4408_v10 }
 0x44e   :  { %2977 = vmatprep.subr.bf16.mxu1 %v4410_v11 }
 0x450   :  { %2896 = vmatpush1.bf16.msra.mxu0 %v4407_v12 }
 0x451   :  { %2978 = vmatpush1.bf16.msra.mxu1 %v4409_v13 }
 0x453   :  { %2898 = vmatmul.mubr.bf16.vlgmr.msra.gmra.mrb[12].mxu0 %v5390_v56 }
 0x454   :  { %2980 = vmatmul.mubr.bf16.vlgmr.msra.gmra.mrb[12].mxu1 %v5390_v56 }
 0x4a6   :  { %v5402_v27 = vpop.f32.mrb[8].mxu0  ;;  %v5404_v14 = vpop.f32.mrb[8].mxu1 }
 0x4a7   :  { %v2990_v16 = vrot.slane %v5402_v27, 4  ;;  %v3038_v20 = vmul.f32 %v5402_v27, %v5402_v27  ;;  %v3002_v21 = vrot.slane %v5404_v14, 4  ;;  %v3040_v1 = vmul.f32 %v5404_v14, %v5404_v14  ;;  %v5412_v22 = vpop.f32.mrb[9].mxu0  ;;  %v5414_v7 = vpop.f32.mrb[9].mxu1 }
 0x4a8   :  { %v2996_v56 = vrot.slane %v5412_v22, 4  ;;  %v3039_v23 = vmul.f32 %v5412_v22, %v5412_v22  ;;  %v3008_v8 = vrot.slane %v5414_v7, 4  ;;  %v3041_v24 = vmul.f32 %v5414_v7, %v5414_v7  ;;  %v2739_v25 = vpop.f32.mrb[10].mxu0  ;;  %v2821_v26 = vpop.f32.mrb[10].mxu1 }
 0x4a9   :  { %v2991_v28 = vadd.f32 %v2990_v16, %v5402_v27  ;;  %v3046_v38 = vrot.slane %v3038_v20, 4  ;;  %v3003_v40 = vadd.f32 %v3002_v21, %v5404_v14  ;;  %v3058_v41 = vrot.slane %v3040_v1, 4  ;;  %v2740_v43 = vpop.f32.mrb[11].mxu0  ;;  %v2822_v44 = vpop.f32.mrb[11].mxu1 }
 0x4aa   :  { %v2997_v45 = vadd.f32 %v2996_v56, %v5412_v22  ;;  %v3052_v46 = vrot.slane %v3039_v23, 4  ;;  %v3009_v47 = vadd.f32 %v3008_v8, %v5414_v7  ;;  %v3064_v48 = vrot.slane %v3041_v24, 4 }
 0x4ab   :  { %v2992_v49 = vrot.slane %v2991_v28, 2  ;;  %v3047_v50 = vadd.f32 %v3046_v38, %v3038_v20  ;;  %v3004_v51 = vrot.slane %v3003_v40, 2  ;;  %v3059_v52 = vadd.f32 %v3058_v41, %v3040_v1 }
 0x4ac   :  { %v2998_v53 = vrot.slane %v2997_v45, 2  ;;  %v3053_v54 = vadd.f32 %v3052_v46, %v3039_v23  ;;  %v3010_v59 = vrot.slane %v3009_v47, 2  ;;  %v3065_v60 = vadd.f32 %v3064_v48, %v3041_v24 }
 0x4ad   :  { %v2993_v61 = vadd.f32 %v2992_v49, %v2991_v28  ;;  %v3048_v63 = vrot.slane %v3047_v50, 2  ;;  %v3005_v39 = vadd.f32 %v3004_v51, %v3003_v40  ;;  %v3060_v42 = vrot.slane %v3059_v52, 2  ;;  %v5429_v51 = vld [vmem:[%s5555_s10] sm:$0xff] }
 0x4ae   :  { %v2999_v55 = vadd.f32 %v2998_v53, %v2997_v45  ;;  %v3054_v57 = vrot.slane %v3053_v54, 2  ;;  %v3011_v58 = vadd.f32 %v3010_v59, %v3009_v47  ;;  %v3066_v62 = vrot.slane %v3065_v60, 2  ;;  %v4735_v53 = vld [vmem:[#allocation13 + $0xc0] sm:$0xff]  }
 0x4af   :  { %v2994_v0 = vrot.slane %v2993_v61, 1  ;;  %v3049_v3 = vadd.f32 %v3048_v63, %v3047_v50  ;;  %v3006_v18 = vrot.slane %v3005_v39, 1  ;;  %v3061_v4 = vadd.f32 %v3060_v42, %v3059_v52  ;;  %v4734_v52 = vld [vmem:[#allocation13 + $0x40] sm:$0xff]   ;;  %4501 = vmatprep.subr.bf16.mxu1 %v4735_v53 }
 0x4b0   :  { %v3000_v5 = vrot.slane %v2999_v55, 1  ;;  %v3055_v6 = vadd.f32 %v3054_v57, %v3053_v54  ;;  %v3012_v31 = vrot.slane %v3011_v58, 1  ;;  %v3067_v32 = vadd.f32 %v3066_v62, %v3065_v60  ;;  %v4736_v59 = vld [vmem:[#allocation13] sm:$0xff]   ;;  %4479 = vmatprep.subr.bf16.mxu0 %v4734_v52  ;;  %v4739_v57 = vld [vmem:[#allocation13 + $0xc8] sm:$0xff]  }
 0x4b1   :  { %v2995_v2 = vadd.f32 %v2994_v0, %v2993_v61  ;;  %v3050_v33 = vrot.slane %v3049_v3, 1  ;;  %v3007_v34 = vadd.f32 %v3006_v18, %v3005_v39  ;;  %v3062_v36 = vrot.slane %v3061_v4, 1  ;;  %v4737_v60 = vld [vmem:[#allocation13 + $0x80] sm:$0xff]   ;;  %4480 = vmatpush3.bf16.msra.mxu0 %v4736_v59  ;;  %v4740_v0 = vld [vmem:[#allocation13 + $0x8] sm:$0xff]  }
 0x4b2   :  { %v3001_v37 = vadd.f32 %v3000_v5, %v2999_v55  ;;  %v3056_v9 = vrot.slane %v3055_v6, 1  ;;  %v3013_v10 = vadd.f32 %v3012_v31, %v3011_v58  ;;  %v3068_v11 = vrot.slane %v3067_v32, 1  ;;  %4502 = vmatpush3.bf16.msra.mxu1 %v4737_v60  ;;  %v4738_v55 = vld [vmem:[#allocation13 + $0x48] sm:$0xff]   ;;  %v4766_v52 = vld [vmem:[#allocation13 + $0x140] sm:$0xff]  }
 0x4b3   :  { %v3051_v12 = vadd.f32 %v3050_v33, %v3049_v3  ;;  %v3094_v13 = vmul.f32 0.125, %v2995_v2  ;;  %v3063_v16 = vadd.f32 %v3062_v36, %v3061_v4  ;;  %v3096_v20 = vmul.f32 0.125, %v3007_v34  ;;  %v4741_v3 = vld [vmem:[#allocation13 + $0x88] sm:$0xff]   ;;  %4481 = vmatprep.subr.bf16.mxu0 %v4738_v55  ;;  %4503 = vmatprep.subr.bf16.mxu1 %v4739_v57  ;;  %v4742_v33 = vld [vmem:[#allocation13 + $0x50] sm:$0xff]   ;;  %v4767_v53 = vld [vmem:[#allocation13 + $0x1c0] sm:$0xff]  }
 0x4b4   :  { %v3057_v21 = vadd.f32 %v3056_v9, %v3055_v6  ;;  %v3095_v1 = vmul.f32 0.125, %v3001_v37  ;;  %v3069_v56 = vadd.f32 %v3068_v11, %v3067_v32  ;;  %v3097_v23 = vmul.f32 0.125, %v3013_v10  ;;  %v4743_v34 = vld [vmem:[#allocation13 + $0xd0] sm:$0xff]  }
 0x4b5   :  { %v3102_v8 = vmul.f32 0.125, %v3051_v12  ;;  %v3110_v24 = vmul.f32 %v3094_v13, %v3094_v13  ;;  %v3104_v25 = vmul.f32 0.125, %v3063_v16  ;;  %v3112_v26 = vmul.f32 %v3096_v20, %v3096_v20  ;;  %4482 = vmatpush3.bf16.msra.mxu0 %v4740_v0  ;;  %v4744_v37 = vld [vmem:[#allocation13 + $0x10] sm:$0xff]   ;;  %v4747_v16 = vld [vmem:[#allocation13 + $0xd8] sm:$0xff]  }
 0x4b6   :  { %v3103_v28 = vmul.f32 0.125, %v3057_v21  ;;  %v3111_v38 = vmul.f32 %v3095_v1, %v3095_v1  ;;  %v3105_v40 = vmul.f32 0.125, %v3069_v56  ;;  %v3113_v41 = vmul.f32 %v3097_v23, %v3097_v23  ;;  %4504 = vmatpush3.bf16.msra.mxu1 %v4741_v3  ;;  %v4745_v9 = vld [vmem:[#allocation13 + $0x90] sm:$0xff]   ;;  %4483 = vmatprep.subr.bf16.mxu0 %v4742_v33  ;;  %v4748_v21 = vld [vmem:[#allocation13 + $0x18] sm:$0xff]  }
 0x4b7   :  { %v3118_v43 = vsub.f32 %v3102_v8, %v3110_v24  ;;  %v3120_v44 = vsub.f32 %v3104_v25, %v3112_v26  ;;  %v3146_v54 = vrot.slane %v5429_v51, %v5267_v17  ;;  %v3154_v61 = vrot.slane %v5429_v51, %v5341_v29  ;;  %4505 = vmatprep.subr.bf16.mxu1 %v4743_v34  ;;  %v4749_v56 = vld [vmem:[#allocation13 + $0x98] sm:$0xff]   ;;  %v4751_v24 = vld [vmem:[#allocation13 + $0xe0] sm:$0xff]  }
 0x4b8   :  { %v3119_v45 = vsub.f32 %v3103_v28, %v3111_v38  ;;  %v3121_v46 = vsub.f32 %v3105_v40, %v3113_v41  ;;  %v3150_v63 = vrot.slane %v5429_v51, %v5273_v19  ;;  %v3158_v42 = vrot.slane %v5429_v51, %v5344_v30  ;;  %v4752_v25 = vld [vmem:[#allocation13 + $0x20] sm:$0xff]   ;;  %v4754_v28 = vld [vmem:[#allocation13 + $0x68] sm:$0xff]  }
 0x4b9   :  { %v3126_v47 = vadd.f32 0.8, %v3118_v43  ;;  %v3128_v48 = vadd.f32 0.8, %v3120_v44  ;;  %4484 = vmatpush3.bf16.msra.mxu0 %v4744_v37  ;;  %v4753_v26 = vld [vmem:[#allocation13 + $0xa0] sm:$0xff]   ;;  %v4755_v38 = vld [vmem:[#allocation13 + $0xe8] sm:$0xff]  }
 0x4ba   :  { %v3127_v49 = vadd.f32 0.8, %v3119_v45  ;;  %v3129_v50 = vadd.f32 0.8, %v3121_v46  ;;  %4506 = vmatpush3.bf16.msra.mxu1 %v4745_v9  ;;  %v4756_v40 = vld [vmem:[#allocation13 + $0x28] sm:$0xff]   ;;  %v4758_v43 = vld [vmem:[#allocation13 + $0x70] sm:$0xff]  }
 0x4bb   :  { %4810 = vrsqrt.f32 %v3126_v47  ;;  %4507 = vmatprep.subr.bf16.mxu1 %v4747_v16  ;;  %v4757_v41 = vld [vmem:[#allocation13 + $0xa8] sm:$0xff]   ;;  %v4759_v44 = vld [vmem:[#allocation13 + $0xf0] sm:$0xff]   ;;  %v4762_v47 = vld [vmem:[#allocation13 + $0x78] sm:$0xff]  }
 0x4bc   :  { %4812 = vrsqrt.f32 %v3128_v48  ;;  %v4760_v45 = vld [vmem:[#allocation13 + $0x30] sm:$0xff]   ;;  %v4763_v48 = vld [vmem:[#allocation13 + $0xf8] sm:$0xff]  }
 0x4bd   :  { %4814 = vrsqrt.f32 %v3127_v49  ;;  %v4761_v46 = vld [vmem:[#allocation13 + $0xb0] sm:$0xff]   ;;  %v4764_v49 = vld [vmem:[#allocation13 + $0x38] sm:$0xff]  }
 0x4be   :  { %4816 = vrsqrt.f32 %v3129_v50  ;;  %4508 = vmatpush3.bf16.msra.mxu1 %v4749_v56  ;;  %v4765_v50 = vld [vmem:[#allocation13 + $0xb8] sm:$0xff]  }
 0x4bf   :  { %4509 = vmatprep.subr.bf16.mxu1 %v4751_v24 }
 0x4c2   :  { %4510 = vmatpush3.bf16.msra.mxu1 %v4753_v26 }
 0x4c3   :  { %4511 = vmatprep.subr.bf16.mxu1 %v4755_v38 }
 0x4c5   :  { %v4811_v39 = vpop.eup %4810 }
 0x4c6   :  { %v4813_v58 = vpop.eup %4812  ;;  %v5439_v62 = vmul.f32 %v4811_v39, %v3146_v54  ;;  %4512 = vmatpush3.bf16.msra.mxu1 %v4757_v41 }
 0x4c7   :  { %v4815_v18 = vpop.eup %4814  ;;  %v5441_v4 = vmul.f32 %v4813_v58, %v3154_v61  ;;  %4513 = vmatprep.subr.bf16.mxu1 %v4759_v44 }
 0x4c8   :  { %v4817_v5 = vpop.eup %4816  ;;  %v3191_v6 = vmul.f32 %v5439_v62, %v3094_v13  ;;  %v5444_v31 = vmul.f32 %v4815_v18, %v3150_v63  ;;  %v4746_v13 = vld [vmem:[#allocation13 + $0x58] sm:$0xff]  }
 0x4c9   :  { %v3193_v32 = vmul.f32 %v5441_v4, %v3096_v20  ;;  %v5447_v2 = vmul.f32 %v4817_v5, %v3158_v42  ;;  %4485 = vmatprep.subr.bf16.mxu0 %v4746_v13 }
 0x4ca   :  { %v3192_v36 = vmul.f32 %v5444_v31, %v3095_v1  ;;  %4486 = vmatpush3.bf16.msra.mxu0 %v4748_v21  ;;  %4514 = vmatpush3.bf16.msra.mxu1 %v4761_v46 }
 0x4cb   :  { %v3194_v10 = vmul.f32 %v5447_v2, %v3097_v23  ;;  %v4750_v23 = vld [vmem:[#allocation13 + $0x60] sm:$0xff]   ;;  %4515 = vmatprep.subr.bf16.mxu1 %v4763_v48 }
 0x4cc   :  { %v3207_v11 = vcombine.low %v3191_v6, %v3192_v36  ;;  %4487 = vmatprep.subr.bf16.mxu0 %v4750_v23 }
 0x4cd   :  { %v3208_v12 = vcombine.low %v3193_v32, %v3194_v10 }
 0x4ce   :  { %v5452_v20 = vrot.slane %v3207_v11, %v5278_v35  ;;  %4488 = vmatpush3.bf16.msra.mxu0 %v4752_v25  ;;  %4516 = vmatpush3.bf16.msra.mxu1 %v4765_v50 }
 0x4cf   :  { %v5455_v8 = vrot.slane %v3208_v12, %v5278_v35  ;;  %4489 = vmatprep.subr.bf16.mxu0 %v4754_v28  ;;  %4545 = vmatprep.subr.bf16.mxu1 %v4767_v53 }
 0x4d1   :  { %v3239_v1 = vcombine.low %v5452_v20, %v5455_v8 }
 0x4d2   :  { %4490 = vmatpush3.bf16.msra.mxu0 %v4756_v40 }
 0x4d3   :  { %4491 = vmatprep.subr.bf16.mxu0 %v4758_v43 }
 0x4d6   :  { %4492 = vmatpush3.bf16.msra.mxu0 %v4760_v45 }
 0x4d7   :  { %4493 = vmatprep.subr.bf16.mxu0 %v4762_v47 }
 0x4da   :  { %4494 = vmatpush3.bf16.msra.mxu0 %v4764_v49 }
 0x4db   :  { %4523 = vmatprep.subr.bf16.mxu0 %v4766_v52 }
 0x526   :  { %v5459_v54 = vpop.f32.mrb[12].mxu0 }
 0x527   :  { %v3014_v59 = vrot.slane %v5459_v54, 4  ;;  %v3042_v60 = vmul.f32 %v5459_v54, %v5459_v54  ;;  %v5464_v61 = vpop.f32.mrb[12].mxu1  ;;  %v5466_v63 = vpop.f32.mrb[13].mxu0 }
 0x528   :  { %v3026_v39 = vrot.slane %v5464_v61, 4  ;;  %v3044_v42 = vmul.f32 %v5464_v61, %v5464_v61  ;;  %v3020_v55 = vrot.slane %v5466_v63, 4  ;;  %v3043_v57 = vmul.f32 %v5466_v63, %v5466_v63  ;;  %v5474_v58 = vpop.f32.mrb[13].mxu1  ;;  %v2903_v0 = vpop.f32.mrb[14].mxu0 }
 0x529   :  { %v3015_v3 = vadd.f32 %v3014_v59, %v5459_v54  ;;  %v3070_v18 = vrot.slane %v3042_v60, 4  ;;  %v3032_v5 = vrot.slane %v5474_v58, 4  ;;  %v3045_v6 = vmul.f32 %v5474_v58, %v5474_v58  ;;  %v2985_v32 = vpop.f32.mrb[14].mxu1  ;;  %v2904_v33 = vpop.f32.mrb[15].mxu0 }
 0x52a   :  { %v3027_v34 = vadd.f32 %v3026_v39, %v5464_v61  ;;  %v3082_v36 = vrot.slane %v3044_v42, 4  ;;  %v3021_v37 = vadd.f32 %v3020_v55, %v5466_v63  ;;  %v3076_v9 = vrot.slane %v3043_v57, 4  ;;  %v2986_v10 = vpop.f32.mrb[15].mxu1 }
 0x52b   :  { %v3016_v11 = vrot.slane %v3015_v3, 2  ;;  %v3071_v12 = vadd.f32 %v3070_v18, %v3042_v60  ;;  %v3033_v13 = vadd.f32 %v3032_v5, %v5474_v58  ;;  %v3088_v16 = vrot.slane %v3045_v6, 4 }
 0x52c   :  { %v3028_v21 = vrot.slane %v3027_v34, 2  ;;  %v3083_v56 = vadd.f32 %v3082_v36, %v3044_v42  ;;  %v3022_v23 = vrot.slane %v3021_v37, 2  ;;  %v3077_v24 = vadd.f32 %v3076_v9, %v3043_v57 }
 0x52d   :  { %v3017_v25 = vadd.f32 %v3016_v11, %v3015_v3  ;;  %v3072_v26 = vrot.slane %v3071_v12, 2  ;;  %v3034_v28 = vrot.slane %v3033_v13, 2  ;;  %v3089_v38 = vadd.f32 %v3088_v16, %v3045_v6 }
 0x52e   :  { %v3029_v40 = vadd.f32 %v3028_v21, %v3027_v34  ;;  %v3084_v41 = vrot.slane %v3083_v56, 2  ;;  %v3023_v43 = vadd.f32 %v3022_v23, %v3021_v37  ;;  %v3078_v44 = vrot.slane %v3077_v24, 2 }
 0x52f   :  { %v3018_v45 = vrot.slane %v3017_v25, 1  ;;  %v3073_v46 = vadd.f32 %v3072_v26, %v3071_v12  ;;  %v3035_v47 = vadd.f32 %v3034_v28, %v3033_v13  ;;  %v3090_v48 = vrot.slane %v3089_v38, 2 }
 0x530   :  { %v3030_v49 = vrot.slane %v3029_v40, 1  ;;  %v3085_v50 = vadd.f32 %v3084_v41, %v3083_v56  ;;  %v3024_v52 = vrot.slane %v3023_v43, 1  ;;  %v3079_v53 = vadd.f32 %v3078_v44, %v3077_v24 }
 0x531   :  { %v3019_v59 = vadd.f32 %v3018_v45, %v3017_v25  ;;  %v3074_v60 = vrot.slane %v3073_v46, 1  ;;  %v3036_v39 = vrot.slane %v3035_v47, 1  ;;  %v3091_v42 = vadd.f32 %v3090_v48, %v3089_v38 }
 0x532   :  { %v3031_v55 = vadd.f32 %v3030_v49, %v3029_v40  ;;  %v3086_v57 = vrot.slane %v3085_v50, 1  ;;  %v3025_v0 = vadd.f32 %v3024_v52, %v3023_v43  ;;  %v3080_v3 = vrot.slane %v3079_v53, 1 }
 0x533   :  { %v3075_v18 = vadd.f32 %v3074_v60, %v3073_v46  ;;  %v3098_v5 = vmul.f32 0.125, %v3019_v59  ;;  %v3037_v6 = vadd.f32 %v3036_v39, %v3035_v47  ;;  %v3092_v32 = vrot.slane %v3091_v42, 1 }
 0x534   :  { %v3087_v33 = vadd.f32 %v3086_v57, %v3085_v50  ;;  %v3100_v34 = vmul.f32 0.125, %v3031_v55  ;;  %v3081_v36 = vadd.f32 %v3080_v3, %v3079_v53  ;;  %v3099_v37 = vmul.f32 0.125, %v3025_v0 }
 0x535   :  { %v3106_v9 = vmul.f32 0.125, %v3075_v18  ;;  %v3114_v10 = vmul.f32 %v3098_v5, %v3098_v5  ;;  %v3093_v11 = vadd.f32 %v3092_v32, %v3091_v42  ;;  %v3101_v12 = vmul.f32 0.125, %v3037_v6 }
 0x536   :  { %v3108_v13 = vmul.f32 0.125, %v3087_v33  ;;  %v3116_v16 = vmul.f32 %v3100_v34, %v3100_v34  ;;  %v3107_v21 = vmul.f32 0.125, %v3081_v36  ;;  %v3115_v56 = vmul.f32 %v3099_v37, %v3099_v37 }
 0x537   :  { %v3122_v23 = vsub.f32 %v3106_v9, %v3114_v10  ;;  %v3109_v24 = vmul.f32 0.125, %v3093_v11  ;;  %v3117_v25 = vmul.f32 %v3101_v12, %v3101_v12  ;;  %v3161_v45 = vsub.s32 4, %v5264_v15 }
 0x538   :  { %v3124_v26 = vsub.f32 %v3108_v13, %v3116_v16  ;;  %v3123_v28 = vsub.f32 %v3107_v21, %v3115_v56  ;;  %v3169_v46 = vsub.s32 6, %v5264_v15  ;;  %v3165_v47 = vsub.s32 5, %v5264_v15 }
 0x539   :  { %v3130_v38 = vadd.f32 0.8, %v3122_v23  ;;  %v3125_v40 = vsub.f32 %v3109_v24, %v3117_v25  ;;  %v3173_v48 = vsub.s32 7, %v5264_v15  ;;  %v3162_v49 = vrot.slane %v5429_v51, %v3161_v45 }
 0x53a   :  { %v3132_v41 = vadd.f32 0.8, %v3124_v26  ;;  %v3131_v43 = vadd.f32 0.8, %v3123_v28  ;;  %v3170_v50 = vrot.slane %v5429_v51, %v3169_v46  ;;  %v3166_v52 = vrot.slane %v5429_v51, %v3165_v47 }
 0x53b   :  { %4818 = vrsqrt.f32 %v3130_v38  ;;  %v3133_v44 = vadd.f32 0.8, %v3125_v40  ;;  %v3174_v59 = vrot.slane %v5429_v51, %v3173_v48  ;;  %v3261_v51 = vrot.slane %v5439_v62, %v5267_v17 }
 0x53c   :  { %4820 = vrsqrt.f32 %v3132_v41  ;;  %v3269_v13 = vrot.slane %v5441_v4, %v5267_v17  ;;  %v2989_v4 = vld [vmem:[%s5556_s11] sm:$0xff]  ;;  %s5058_s11 = smov [#allocation16]  }
 0x53d   :  { %4822 = vrsqrt.f32 %v3131_v43  ;;  %v3290_v20 = vmul.f32 %v3261_v51, %v5402_v27  ;;  %v4777_v51 = vld [vmem:[#allocation13 + $0x190] sm:$0xff]   ;;  %s4058_s27 = sshll.u32 %s5058_s11, 4  ;;  %s4059_s27 = int_to_ptr.vmem [resolvable:$true] %s4058_s27 }
 0x53e   :  { %4824 = vrsqrt.f32 %v3133_v44  ;;  %v3292_v8 = vmul.f32 %v3269_v13, %v5404_v14  ;;  %v4778_v13 = vld [vmem:[#allocation13 + $0x158] sm:$0xff]   ;;  %s5004_s3 = scalar_lea.vmem %s4059_s27, 128  ;;  %p5009_p9 = scmp.lt.s32.totalorder %s4059_s27, %s4059_s27 }
 0x53f   :  { %p5005_p8 = scmp.ne.s32.totalorder %s4059_s27, %s5004_s3  ;;  %p5010_p10 = scmp.lt.s32.totalorder %s5004_s3, %s5004_s3 }
 0x541   :  { %p5011_p11 = por %p5010_p10, %p5009_p9 }
 0x543   :  { %p5012_p12 = pnand %p5011_p11, %p5005_p8 }
 0x545   :  { %v4819_v53 = vpop.eup %4818 }
 0x546   :  { %v4821_v60 = vpop.eup %4820  ;;  %v3187_v39 = vmul.f32 %v4819_v53, %v3162_v49 }
 0x547   :  { %v4823_v42 = vpop.eup %4822  ;;  %v3189_v55 = vmul.f32 %v4821_v60, %v3170_v50 }
 0x548   :  { %v4825_v57 = vpop.eup %4824  ;;  %v3195_v0 = vmul.f32 %v3187_v39, %v3098_v5  ;;  %v3188_v3 = vmul.f32 %v4823_v42, %v3166_v52  ;;  %v3265_v5 = vrot.slane %v5444_v31, %v5267_v17  ;;  %v3277_v16 = vrot.slane %v3187_v39, %v5267_v17 }
 0x549   :  { %v3197_v18 = vmul.f32 %v3189_v55, %v3100_v34  ;;  %v3190_v6 = vmul.f32 %v4825_v57, %v3174_v59  ;;  %v3247_v34 = vrot.slane %v3239_v1, %v5278_v35  ;;  %v3285_v62 = vrot.slane %v3189_v55, %v5267_v17  ;;  %v4768_v57 = vld [vmem:[#allocation13 + $0x100] sm:$0xff]  }
 0x54a   :  { %v3196_v32 = vmul.f32 %v3188_v3, %v3099_v37  ;;  %v3273_v37 = vrot.slane %v5447_v2, %v5267_v17  ;;  %v3281_v21 = vrot.slane %v3188_v3, %v5267_v17  ;;  %v3291_v2 = vmul.f32 %v3265_v5, %v5412_v22  ;;  %v4779_v5 = vld [vmem:[#allocation13 + $0x1d8] sm:$0xff]  }
 0x54b   :  { %v3198_v15 = vmul.f32 %v3190_v6, %v3101_v12  ;;  %v3289_v31 = vrot.slane %v3190_v6, %v5267_v17  ;;  %v3294_v23 = vmul.f32 %v3277_v16, %v5459_v54  ;;  %v3296_v24 = vmul.f32 %v3285_v62, %v5464_v61  ;;  %v4771_v6 = vld [vmem:[#allocation13 + $0x1c8] sm:$0xff]   ;;  %v4783_v16 = vld [vmem:[#allocation13 + $0x1e0] sm:$0xff]  }
 0x54c   :  { %v3209_v33 = vcombine.low %v3195_v0, %v3196_v32  ;;  %v3295_v25 = vmul.f32 %v3281_v21, %v5466_v63  ;;  %v4769_v0 = vld [vmem:[#allocation13 + $0x180] sm:$0xff]  }
 0x54d   :  { %v3210_v36 = vcombine.low %v3197_v18, %v3198_v15  ;;  %v3297_v26 = vmul.f32 %v3289_v31, %v5474_v58  ;;  %v4770_v18 = vld [vmem:[#allocation13 + $0x148] sm:$0xff]   ;;  %v4784_v62 = vld [vmem:[#allocation13 + $0x120] sm:$0xff]  }
 0x54e   :  { %v3231_v9 = vrot.slane %v3209_v33, %v5278_v35  ;;  %v4772_v33 = vld [vmem:[#allocation13 + $0x108] sm:$0xff]   ;;  %v4785_v21 = vld [vmem:[#allocation13 + $0x1a0] sm:$0xff]  }
 0x54f   :  { %v3238_v10 = vrot.slane %v3210_v36, %v5278_v35  ;;  %v4773_v36 = vld [vmem:[#allocation13 + $0x188] sm:$0xff]  }
 0x550   :  { %v4787_v31 = vld [vmem:[#allocation13 + $0x1e8] sm:$0xff]  }
 0x551   :  { %v3240_v11 = vcombine.low %v3231_v9, %v3238_v10  ;;  %v4774_v9 = vld [vmem:[#allocation13 + $0x150] sm:$0xff]  }
 0x552   :  { %v4775_v10 = vld [vmem:[#allocation13 + $0x1d0] sm:$0xff]  }
 0x553   :  { %v3254_v12 = vrot.slane %v3240_v11, %v5278_v35  ;;  %v3293_v35 = vmul.f32 %v3273_v37, %v5414_v7  ;;  %v4776_v11 = vld [vmem:[#allocation13 + $0x110] sm:$0xff]   ;;  %v4781_v37 = vld [vmem:[#allocation13 + $0x198] sm:$0xff]  }
 0x555   :  { %v3255_v56 = vcombine.low %v3247_v34, %v3254_v12  ;;  %v4780_v34 = vld [vmem:[#allocation13 + $0x118] sm:$0xff]   ;;  %v4782_v12 = vld [vmem:[#allocation13 + $0x160] sm:$0xff]  }
 0x557   :  { %v3257_v1 = vsub.f32 %v2989_v4, %v3255_v56  ;;  %v4786_v4 = vld [vmem:[#allocation13 + $0x168] sm:$0xff]  }
 0x558   :  { %v4788_v56 = vld [vmem:[#allocation13 + $0x128] sm:$0xff]  }
 0x559   :  { %v3306_v28 = vrot.slane %v3257_v1, %v5273_v19  ;;  %v3314_v38 = vrot.slane %v3257_v1, %v5344_v30  ;;  %v3302_v27 = vrot.slane %v3257_v1, %v5267_v17  ;;  %v3310_v14 = vrot.slane %v3257_v1, %v5341_v29 }
 0x55a   :  { %v3322_v22 = vrot.slane %v3257_v1, %v3165_v47  ;;  %v3330_v40 = vrot.slane %v3257_v1, %v3173_v48  ;;  %v3318_v7 = vrot.slane %v3257_v1, %v3161_v45  ;;  %v3326_v41 = vrot.slane %v3257_v1, %v3169_v46  ;;  %v4793_v1 = vld [vmem:[#allocation13 + $0x1b0] sm:$0xff]  }
 0x55b   :  { %v3340_v43 = vadd.f32 %v3306_v28, %v3291_v2  ;;  %v3342_v54 = vadd.f32 %v3314_v38, %v3293_v35  ;;  %v3339_v44 = vadd.f32 %v3302_v27, %v3290_v20  ;;  %v3341_v61 = vadd.f32 %v3310_v14, %v3292_v8  ;;  %v4789_v20 = vld [vmem:[#allocation13 + $0x1a8] sm:$0xff]   ;;  %v4790_v8 = vld [vmem:[#allocation13 + $0x170] sm:$0xff]   ;;  %v4796_v28 = vld [vmem:[#allocation13 + $0x138] sm:$0xff]  }
 0x55c   :  { %v3344_v49 = vadd.f32 %v3322_v22, %v3295_v25  ;;  %v3346_v63 = vadd.f32 %v3330_v40, %v3297_v26  ;;  %v5525_v50 = vadd.f32 %v3318_v7, %v3294_v23  ;;  %v5527_v58 = vadd.f32 %v3326_v41, %v3296_v24  ;;  %v4791_v2 = vld [vmem:[#allocation13 + $0x1f0] sm:$0xff]   ;;  %v4794_v23 = vld [vmem:[#allocation13 + $0x178] sm:$0xff]  }
 0x55d   :  { %v3348_v19 = vmul.f32 0.2, %v3340_v43  ;;  %v3350_v30 = vmul.f32 0.2, %v3342_v54  ;;  %v3347_v52 = vmul.f32 0.2, %v3339_v44 }
 0x55e   :  { %v3349_v17 = vmul.f32 0.2, %v3341_v61  ;;  %v3352_v53 = vmul.f32 0.2, %v3344_v49  ;;  %v3354_v29 = vmul.f32 0.2, %v3346_v63 }
 0x55f   :  { %v3356_v47 = vmax.f32 %v3340_v43, %v3348_v19  ;;  %v3358_v48 = vmax.f32 %v3342_v54, %v3350_v30  ;;  %v3355_v45 = vmax.f32 %v3339_v44, %v3347_v52  ;;  %v4792_v35 = vld [vmem:[#allocation13 + $0x130] sm:$0xff]   ;;  %v4795_v24 = vld [vmem:[#allocation13 + $0x1f8] sm:$0xff]   ;;  %v3351_v25 = vmul.f32 0.2, %v5525_v50  ;;  %v4411_v43 = vld [vmem:[#allocation14] ss:$0 sm:$0xff] }
 0x560   :  { %v3357_v46 = vmax.f32 %v3341_v61, %v3349_v17  ;;  %v3360_v59 = vmax.f32 %v3344_v49, %v3352_v53  ;;  %v3362_v60 = vmax.f32 %v3346_v63, %v3354_v29  ;;  %v3353_v26 = vmul.f32 0.2, %v5527_v58  ;;  %v4797_v38 = vld [vmem:[#allocation13 + $0x1b8] sm:$0xff]  }
 0x561   :  { %v3364_v39 = vpack.c.bf16 %v3356_v47, %v3356_v47  ;;  %v3366_v42 = vpack.c.bf16 %v3358_v48, %v3358_v48  ;;  %v3363_v55 = vpack.c.bf16 %v3355_v45, %v3355_v45  ;;  %v3359_v27 = vmax.f32 %v5525_v50, %v3351_v25 }
 0x562   :  { %v3365_v3 = vpack.c.bf16 %v3357_v46, %v3357_v46  ;;  %v3368_v32 = vpack.c.bf16 %v3360_v59, %v3360_v59  ;;  %v3370_v15 = vpack.c.bf16 %v3362_v60, %v3362_v60  ;;  %v3361_v14 = vmax.f32 %v5527_v58, %v3353_v26 }
 0x563   :  { %3922 = vmatprep.mubr.bf16.mxu0 %v3364_v39  ;;  %3962 = vmatprep.mubr.bf16.mxu1 %v3366_v42  ;;  %v3367_v22 = vpack.c.bf16 %v3359_v27, %v3359_v27 }
 0x564   :  { %3923 = vmatmul.mubr.bf16.vlgmr.msra.gmra.mrb[16].mxu0 %v3363_v55  ;;  %3963 = vmatmul.mubr.bf16.vlgmr.msra.gmra.mrb[16].mxu1 %v3365_v3  ;;  %v3369_v40 = vpack.c.bf16 %v3361_v14, %v3361_v14 }
 0x565   :  { %4524 = vmatpush3.bf16.msra.mxu0 %v4768_v57  ;;  %4546 = vmatpush3.bf16.msra.mxu1 %v4769_v0 }
 0x566   :  { %4002 = vmatprep.mubr.bf16.mxu0 %v3368_v32  ;;  %4042 = vmatprep.mubr.bf16.mxu1 %v3370_v15 }
 0x567   :  { %4525 = vmatprep.subr.bf16.mxu0 %v4770_v18  ;;  %4547 = vmatprep.subr.bf16.mxu1 %v4771_v6 }
 0x569   :  { %4526 = vmatpush3.bf16.msra.mxu0 %v4772_v33  ;;  %4548 = vmatpush3.bf16.msra.mxu1 %v4773_v36 }
 0x56a   :  { %4527 = vmatprep.subr.bf16.mxu0 %v4774_v9  ;;  %4549 = vmatprep.subr.bf16.mxu1 %v4775_v10 }
 0x56d   :  { %4528 = vmatpush3.bf16.msra.mxu0 %v4776_v11  ;;  %4550 = vmatpush3.bf16.msra.mxu1 %v4777_v51 }
 0x56e   :  { %4529 = vmatprep.subr.bf16.mxu0 %v4778_v13  ;;  %4551 = vmatprep.subr.bf16.mxu1 %v4779_v5 }
 0x571   :  { %4530 = vmatpush3.bf16.msra.mxu0 %v4780_v34  ;;  %4552 = vmatpush3.bf16.msra.mxu1 %v4781_v37 }
 0x572   :  { %4531 = vmatprep.subr.bf16.mxu0 %v4782_v12  ;;  %4553 = vmatprep.subr.bf16.mxu1 %v4783_v16 }
 0x575   :  { %4532 = vmatpush3.bf16.msra.mxu0 %v4784_v62  ;;  %4554 = vmatpush3.bf16.msra.mxu1 %v4785_v21 }
 0x576   :  { %4533 = vmatprep.subr.bf16.mxu0 %v4786_v4  ;;  %4555 = vmatprep.subr.bf16.mxu1 %v4787_v31 }
 0x579   :  { %4534 = vmatpush3.bf16.msra.mxu0 %v4788_v56  ;;  %4556 = vmatpush3.bf16.msra.mxu1 %v4789_v20 }
 0x57a   :  { %4535 = vmatprep.subr.bf16.mxu0 %v4790_v8  ;;  %4557 = vmatprep.subr.bf16.mxu1 %v4791_v2 }
 0x57d   :  { %4536 = vmatpush3.bf16.msra.mxu0 %v4792_v35  ;;  %4558 = vmatpush3.bf16.msra.mxu1 %v4793_v1 }
 0x57e   :  { %4537 = vmatprep.subr.bf16.mxu0 %v4794_v23  ;;  %4559 = vmatprep.subr.bf16.mxu1 %v4795_v24 }
 0x581   :  { %4538 = vmatpush3.bf16.msra.mxu0 %v4796_v28  ;;  %4560 = vmatpush3.bf16.msra.mxu1 %v4797_v38 }
 0x584   :  { %4003 = vmatmul.mubr.bf16.vlgmr.msra.gmra.mrb[20].mxu0 %v3367_v22  ;;  %4043 = vmatmul.mubr.bf16.vlgmr.msra.gmra.mrb[20].mxu1 %v3369_v40 }
 0x637   :  { %v4495_v7 = vpop.f32.mrb[16].mxu0  ;;  %v4517_v41 = vpop.f32.mrb[16].mxu1 }
 0x638   :  { %v4496_v54 = vpop.f32.mrb[17].mxu0  ;;  %v4518_v44 = vpop.f32.mrb[17].mxu1 }
 0x639   :  { %v4497_v61 = vadd.f32 %v4496_v54, %v4495_v7  ;;  %v4519_v49 = vadd.f32 %v4518_v44, %v4517_v41  ;;  %v4498_v63 = vpop.f32.mrb[18].mxu0  ;;  %v4520_v19 = vpop.f32.mrb[18].mxu1 }
 0x63a   :  { %v4499_v30 = vpop.f32.mrb[19].mxu0  ;;  %v4521_v52 = vpop.f32.mrb[19].mxu1 }
 0x63b   :  { %v3925_v50 = vadd.f32 %v4497_v61, %v4411_v43 }
 0x63d   :  { %v3965_v17 = vadd.f32 %v4519_v49, %v3925_v50 }
 0x657   :  { %v4539_v58 = vpop.f32.mrb[20].mxu0  ;;  %v4561_v53 = vpop.f32.mrb[20].mxu1 }
 0x658   :  { %v4540_v29 = vpop.f32.mrb[21].mxu0  ;;  %v4562_v47 = vpop.f32.mrb[21].mxu1 }
 0x659   :  { %v4541_v48 = vadd.f32 %v4540_v29, %v4539_v58  ;;  %v4563_v45 = vadd.f32 %v4562_v47, %v4561_v53  ;;  %v4542_v46 = vpop.f32.mrb[22].mxu0  ;;  %v4564_v59 = vpop.f32.mrb[22].mxu1 }
 0x65a   :  { %v4543_v60 = vpop.f32.mrb[23].mxu0  ;;  %v4565_v39 = vpop.f32.mrb[23].mxu1 }
 0x65b   :  { %v4005_v42 = vadd.f32 %v4541_v48, %v3965_v17 }
 0x65d   :  { %v4045_v55 = vadd.f32 %v4563_v45, %v4005_v42 }
 0x65f   :  { %4826 = vtanh.f32 %v4045_v55 }
 0x669   :  { %v4827_v57 = vpop.eup %4826 }
 0x66a   :  { %4051 = vst [vmem:[#allocation16] sm:$0xff] %v4827_v57 }
 0x66b   :  { %5015 = shalt.err (!%p5012_p12)
}
 0x66c   :  { %s5016_s20 = scalar_lea.hbm %s5559_s14, 128 }
 0x66d   :  { %p5017_p13 = scmp.ne.s32.totalorder %s5559_s14, %s5016_s20  ;;  %p5020_p0 = scmp.lt.u32.totalorder %s5016_s20, %s5559_s14 }
 0x66f   :  { %p5022_p1 = pnand %p5020_p0, %p5017_p13 }
 0x671   :  { %5025 = shalt.err (!%p5022_p1)
}
 0x672   :  { %4061 = dma.vmem_to_hbm [thread:$0]  %s4059_s27, 128, %s5559_s14, [#allocation4]  }
 0x673   :  { %5036 = dma.done.wait [#allocation4], 128  }
 0x674   :  { %5037 = vsyncadd [#allocation4], 4294967168 }
 0x675   :  { %4065 = vsyncpa [#allocation3], 1 }
 0x676   :  { %4066 = vsyncpa [#allocation6], 1 }
 0x677   :  { %4067 = vsyncpa [#allocation9], 1 }
 0x678   :  { %4068 = vsyncpa [#allocation12], 1 }
 0x679   :  { %4069 = vsyncpa [#allocation15], 1 }
 0x67a   :  { %4070 = vsyncpa [#allocation4], 1 }

</bundles_post_ra>
